<compile_context>
chip_gen: v6e
topology: v6e:2x2x1
jax: 0.10.0
libtpu: 0.0.40
codegen_flags: <defaults>
</compile_context>

<pallas_src>
import functools

import jax
import jax.numpy as jnp
from jax.experimental import pallas as pl
from jax.experimental.pallas import tpu as pltpu

_DIMS = (784, 512, 256, 128, 64, 10)
_TOTAL_MACS = sum(_DIMS[i] * _DIMS[i + 1] for i in range(5))   # 574080
_MAX_TILE = 2048


def _mlp_kernel(x_ref, w1_ref, w2_ref, w3_ref, w4_ref, w5_ref, b_ref, o_ref):
    # b_ref is the (8, 512) f32 bias stack; row i holds layer-(i+1) bias padded
    # with zeros to 512 lanes.  All slices below are static.
    # Layer 1: (TB,784)bf16 @ (784,512)bf16 -> f32 acc; bias + ReLU in f32.
    h = jnp.dot(x_ref[...], w1_ref[...], preferred_element_type=jnp.float32)
    h = jnp.maximum(h + b_ref[0:1, :_DIMS[1]], 0.0)
    # Layer 2
    h = jnp.dot(h.astype(jnp.bfloat16), w2_ref[...],
                preferred_element_type=jnp.float32)
    h = jnp.maximum(h + b_ref[1:2, :_DIMS[2]], 0.0)
    # Layer 3
    h = jnp.dot(h.astype(jnp.bfloat16), w3_ref[...],
                preferred_element_type=jnp.float32)
    h = jnp.maximum(h + b_ref[2:3, :_DIMS[3]], 0.0)
    # Layer 4
    h = jnp.dot(h.astype(jnp.bfloat16), w4_ref[...],
                preferred_element_type=jnp.float32)
    h = jnp.maximum(h + b_ref[3:4, :_DIMS[4]], 0.0)
    # Layer 5 (logits, no activation)
    h = jnp.dot(h.astype(jnp.bfloat16), w5_ref[...],
                preferred_element_type=jnp.float32)
    o_ref[...] = h + b_ref[4:5, :_DIMS[5]]


def prepare_params(params):
    """One-time preparation (call OUTSIDE the per-forward path).

    PyTorch-layout (out, in) weights -> (in, out) bf16; the five biases are
    packed into a single zero-padded (8, 512) f32 stack (row i = layer i+1)."""
    weights = []
    bias_stack = jnp.zeros((8, _DIMS[1]), jnp.float32)
    for i, (w, b) in enumerate(params):
        weights.append(jnp.asarray(w, jnp.float32).T.astype(jnp.bfloat16))
        bias_stack = bias_stack.at[i, : _DIMS[i + 1]].set(
            jnp.asarray(b, jnp.float32))
    return tuple(weights) + (bias_stack,)


def _round_up(n, m):
    return ((n + m - 1) // m) * m


def _is_v7():
    """True on 2-TensorCore chips (v7x); used to gate CORE_PARALLEL."""
    try:
        kind = jax.devices()[0].device_kind.lower()
    except Exception:
        return False
    return ("v7" in kind) or ("7x" in kind)


def _choose_tile_b(b, split_for_cores):
    """Pick a batch-tile size tracking B to avoid up-to-2x padding waste."""
    if b <= _MAX_TILE:
        if split_for_cores and b >= 512:
            # Two tiles so both v7x TensorCores get work.
            return _round_up((b + 1) // 2, 16)
        # Single tile, rounded to 16 rows for native bf16 sublane packing.
        return _round_up(max(b, 16), 16)
    # Large batch: biggest tile whose padding waste stays small.
    for t in (2048, 1024, 512, 256):
        if _round_up(b, t) - b <= max(b // 16, t // 4):
            return t
    return 256


@functools.partial(jax.jit, static_argnames=("tile_b", "core_parallel"))
def _net_forward_padded(x2d_bf16, flat_params, *, tile_b, core_parallel):
    """x2d_bf16: (B_pad, 784) bf16 with B_pad a multiple of tile_b."""
    b_pad = x2d_bf16.shape[0]
    grid = (b_pad // tile_b,)

    in_specs = [pl.BlockSpec((tile_b, _DIMS[0]), lambda i: (i, 0))]
    # Weights + bias stack: full-array blocks with constant index maps ->
    # DMA'd once and VMEM-resident for the whole call (~1.1 MiB bf16 total).
    for a in flat_params:
        in_specs.append(pl.BlockSpec(a.shape, lambda i: (0, 0)))

    semantics = (pltpu.CORE_PARALLEL,) if core_parallel else ("parallel",)

    cost = pl.CostEstimate(
        flops=2 * b_pad * _TOTAL_MACS,
        transcendentals=0,
        bytes_accessed=(b_pad * _DIMS[0] * 2        # activations in (bf16)
                        + b_pad * _DIMS[-1] * 4     # logits out (f32)
                        + _TOTAL_MACS * 2           # weights (bf16)
                        + 8 * _DIMS[1] * 4))        # bias stack (f32)

    return pl.pallas_call(
        _mlp_kernel,
        out_shape=jax.ShapeDtypeStruct((b_pad, _DIMS[-1]), jnp.float32),
        grid=grid,
        in_specs=in_specs,
        out_specs=pl.BlockSpec((tile_b, _DIMS[-1]), lambda i: (i, 0)),
        compiler_params=pltpu.CompilerParams(
            dimension_semantics=semantics,
            vmem_limit_bytes=48 * 1024 * 1024),
        cost_estimate=cost,
    )(x2d_bf16, *flat_params)


def net_forward(x, flat_params, tile_b=None):
    """x: any shape flattening to (-1, 784), e.g. (B, 1, 28, 28).
    flat_params: output of prepare_params()."""
    x2d = x.reshape(-1, _DIMS[0]).astype(jnp.bfloat16)
    b = x2d.shape[0]
    split_for_cores = _is_v7()
    if tile_b is None:
        tile_b = _choose_tile_b(b, split_for_cores)
    b_pad = _round_up(b, tile_b)
    if b_pad != b:
        x2d = jnp.pad(x2d, ((0, b_pad - b), (0, 0)))
    core_parallel = split_for_cores and (b_pad // tile_b) >= 2
    out = _net_forward_padded(x2d, flat_params, tile_b=tile_b,
                              core_parallel=core_parallel)
    return out[:b]


def init_params(key):
    """Deterministic init mimicking torch.nn.Linear defaults
    (uniform(-1/sqrt(in), 1/sqrt(in)) for both weight and bias)."""
    params = []
    for i in range(5):
        fan_in, fan_out = _DIMS[i], _DIMS[i + 1]
        key, kw, kb = jax.random.split(key, 3)
        bound = 1.0 / jnp.sqrt(jnp.float32(fan_in))
        w = jax.random.uniform(kw, (fan_out, fan_in), jnp.float32, -bound, bound)
        b = jax.random.uniform(kb, (fan_out,), jnp.float32, -bound, bound)
        params.append((w, b))
    return params


if __name__ == "__main__":
    key = jax.random.PRNGKey(0)
    key, kx = jax.random.split(key)
    # Small MNIST-like batch: (B, C, H, W) = (8, 1, 28, 28) -> flattens to (8, 784)
    x = jax.random.normal(kx, (8, 1, 28, 28), jnp.float32)
    params = init_params(key)
    flat_params = prepare_params(params)   # one-time weight/bias prep

    out = net_forward(x, flat_params)
    out = jax.block_until_ready(out)
    assert out.shape == (8, 10), out.shape

    # Reference using the same bf16-matmul / f32-accumulate math.
    # (bf16 inputs deviate from a pure-f32 torch model at the ~1e-2 level; keep
    # x and W1 in f32 if tighter parity is ever required.)
    ref = x.reshape(-1, _DIMS[0]).astype(jnp.bfloat16)
    bias_stack = flat_params[5]
    for i in range(5):
        w_t = flat_params[i]
        bias = bias_stack[i, : _DIMS[i + 1]]
        ref = jnp.dot(ref, w_t, preferred_element_type=jnp.float32) + bias
        if i < 4:
            ref = jnp.maximum(ref, 0.0).astype(jnp.bfloat16)
    assert jnp.allclose(out, ref, atol=1e-2, rtol=1e-2), (
        float(jnp.max(jnp.abs(out - ref))))

    print("KERNEL_OK")
</pallas_src>

<mosaic_0001>
module attributes {stable_mosaic.version = 11 : i64} {
  func.func @_mlp_kernel(%arg0: i32, %arg1: memref<16x784xbf16, #tpu.memory_space<vmem>>, %arg2: memref<784x512xbf16, #tpu.memory_space<vmem>>, %arg3: memref<512x256xbf16, #tpu.memory_space<vmem>>, %arg4: memref<256x128xbf16, #tpu.memory_space<vmem>>, %arg5: memref<128x64xbf16, #tpu.memory_space<vmem>>, %arg6: memref<64x10xbf16, #tpu.memory_space<vmem>>, %arg7: memref<8x512xf32, #tpu.memory_space<vmem>>, %arg8: memref<16x10xf32, #tpu.memory_space<vmem>>) attributes {dimension_semantics = [#tpu.dimension_semantics<parallel>], iteration_bounds = array<i64: 1>, scalar_prefetch = 0 : i64, scratch_operands = 0 : i64, tpu.core_type = #tpu.core_type<tc>, window_params = [{transform_indices = @transform_0, window_bounds = array<i64: 16, 784>}, {pipeline_mode = #tpu.pipeline_mode<synchronous>, transform_indices = @transform_1, window_bounds = array<i64: 784, 512>}, {pipeline_mode = #tpu.pipeline_mode<synchronous>, transform_indices = @transform_2, window_bounds = array<i64: 512, 256>}, {pipeline_mode = #tpu.pipeline_mode<synchronous>, transform_indices = @transform_3, window_bounds = array<i64: 256, 128>}, {pipeline_mode = #tpu.pipeline_mode<synchronous>, transform_indices = @transform_4, window_bounds = array<i64: 128, 64>}, {pipeline_mode = #tpu.pipeline_mode<synchronous>, transform_indices = @transform_5, window_bounds = array<i64: 64, 10>}, {pipeline_mode = #tpu.pipeline_mode<synchronous>, transform_indices = @transform_6, window_bounds = array<i64: 8, 512>}, {transform_indices = @transform_7, window_bounds = array<i64: 16, 10>}]} {
    %c0 = arith.constant 0 : index
    %c0_0 = arith.constant 0 : index
    %0 = vector.load %arg1[%c0, %c0_0] : memref<16x784xbf16, #tpu.memory_space<vmem>>, vector<16x784xbf16>
    %c0_1 = arith.constant 0 : index
    %c0_2 = arith.constant 0 : index
    %1 = vector.load %arg2[%c0_1, %c0_2] : memref<784x512xbf16, #tpu.memory_space<vmem>>, vector<784x512xbf16>
    %cst = arith.constant dense<0.000000e+00> : vector<16x512xf32>
    %2 = tpu.matmul %0, %1, %cst {dimension_numbers = #tpu.dot_dimension_numbers<[1], [0], [0], [1], [0, 0, 1, 1], [], []>} : vector<16x784xbf16>, vector<784x512xbf16>, vector<16x512xf32> -> vector<16x512xf32>
    %c0_3 = arith.constant 0 : index
    %c0_4 = arith.constant 0 : index
    %3 = vector.load %arg7[%c0_3, %c0_4] : memref<8x512xf32, #tpu.memory_space<vmem>>, vector<1x512xf32>
    %4 = vector.broadcast %3 : vector<1x512xf32> to vector<16x512xf32>
    %5 = arith.addf %2, %4 : vector<16x512xf32>
    %cst_5 = arith.constant 0.000000e+00 : f32
    %6 = vector.broadcast %cst_5 : f32 to vector<16x512xf32>
    %7 = arith.maximumf %5, %6 : vector<16x512xf32>
    %8 = arith.truncf %7 : vector<16x512xf32> to vector<16x512xbf16>
    %c0_6 = arith.constant 0 : index
    %c0_7 = arith.constant 0 : index
    %9 = vector.load %arg3[%c0_6, %c0_7] : memref<512x256xbf16, #tpu.memory_space<vmem>>, vector<512x256xbf16>
    %cst_8 = arith.constant dense<0.000000e+00> : vector<16x256xf32>
    %10 = tpu.matmul %8, %9, %cst_8 {dimension_numbers = #tpu.dot_dimension_numbers<[1], [0], [0], [1], [0, 0, 1, 1], [], []>} : vector<16x512xbf16>, vector<512x256xbf16>, vector<16x256xf32> -> vector<16x256xf32>
    %c1 = arith.constant 1 : index
    %c0_9 = arith.constant 0 : index
    %11 = vector.load %arg7[%c1, %c0_9] : memref<8x512xf32, #tpu.memory_space<vmem>>, vector<1x256xf32>
    %12 = vector.broadcast %11 : vector<1x256xf32> to vector<16x256xf32>
    %13 = arith.addf %10, %12 : vector<16x256xf32>
    %cst_10 = arith.constant 0.000000e+00 : f32
    %14 = vector.broadcast %cst_10 : f32 to vector<16x256xf32>
    %15 = arith.maximumf %13, %14 : vector<16x256xf32>
    %16 = arith.truncf %15 : vector<16x256xf32> to vector<16x256xbf16>
    %c0_11 = arith.constant 0 : index
    %c0_12 = arith.constant 0 : index
    %17 = vector.load %arg4[%c0_11, %c0_12] : memref<256x128xbf16, #tpu.memory_space<vmem>>, vector<256x128xbf16>
    %cst_13 = arith.constant dense<0.000000e+00> : vector<16x128xf32>
    %18 = tpu.matmul %16, %17, %cst_13 {dimension_numbers = #tpu.dot_dimension_numbers<[1], [0], [0], [1], [0, 0, 1, 1], [], []>} : vector<16x256xbf16>, vector<256x128xbf16>, vector<16x128xf32> -> vector<16x128xf32>
    %c2 = arith.constant 2 : index
    %c0_14 = arith.constant 0 : index
    %19 = vector.load %arg7[%c2, %c0_14] : memref<8x512xf32, #tpu.memory_space<vmem>>, vector<1x128xf32>
    %20 = vector.broadcast %19 : vector<1x128xf32> to vector<16x128xf32>
    %21 = arith.addf %18, %20 : vector<16x128xf32>
    %cst_15 = arith.constant 0.000000e+00 : f32
    %22 = vector.broadcast %cst_15 : f32 to vector<16x128xf32>
    %23 = arith.maximumf %21, %22 : vector<16x128xf32>
    %24 = arith.truncf %23 : vector<16x128xf32> to vector<16x128xbf16>
    %c0_16 = arith.constant 0 : index
    %c0_17 = arith.constant 0 : index
    %25 = vector.load %arg5[%c0_16, %c0_17] : memref<128x64xbf16, #tpu.memory_space<vmem>>, vector<128x64xbf16>
    %cst_18 = arith.constant dense<0.000000e+00> : vector<16x64xf32>
    %26 = tpu.matmul %24, %25, %cst_18 {dimension_numbers = #tpu.dot_dimension_numbers<[1], [0], [0], [1], [0, 0, 1, 1], [], []>} : vector<16x128xbf16>, vector<128x64xbf16>, vector<16x64xf32> -> vector<16x64xf32>
    %c3 = arith.constant 3 : index
    %c0_19 = arith.constant 0 : index
    %27 = vector.load %arg7[%c3, %c0_19] : memref<8x512xf32, #tpu.memory_space<vmem>>, vector<1x64xf32>
    %28 = vector.broadcast %27 : vector<1x64xf32> to vector<16x64xf32>
    %29 = arith.addf %26, %28 : vector<16x64xf32>
    %cst_20 = arith.constant 0.000000e+00 : f32
    %30 = vector.broadcast %cst_20 : f32 to vector<16x64xf32>
    %31 = arith.maximumf %29, %30 : vector<16x64xf32>
    %32 = arith.truncf %31 : vector<16x64xf32> to vector<16x64xbf16>
    %c0_21 = arith.constant 0 : index
    %c0_22 = arith.constant 0 : index
    %33 = vector.load %arg6[%c0_21, %c0_22] : memref<64x10xbf16, #tpu.memory_space<vmem>>, vector<64x10xbf16>
    %cst_23 = arith.constant dense<0.000000e+00> : vector<16x10xf32>
    %34 = tpu.matmul %32, %33, %cst_23 {dimension_numbers = #tpu.dot_dimension_numbers<[1], [0], [0], [1], [0, 0, 1, 1], [], []>} : vector<16x64xbf16>, vector<64x10xbf16>, vector<16x10xf32> -> vector<16x10xf32>
    %c4 = arith.constant 4 : index
    %c0_24 = arith.constant 0 : index
    %35 = vector.load %arg7[%c4, %c0_24] : memref<8x512xf32, #tpu.memory_space<vmem>>, vector<1x10xf32>
    %36 = vector.broadcast %35 : vector<1x10xf32> to vector<16x10xf32>
    %37 = arith.addf %34, %36 : vector<16x10xf32>
    %c0_25 = arith.constant 0 : index
    %c0_26 = arith.constant 0 : index
    %38 = vector.load %arg8[%c0_25, %c0_26] : memref<16x10xf32, #tpu.memory_space<vmem>>, vector<16x10xf32>
    tpu.vector_store %arg8[%c0_25, %c0_26], %37 {strides = array<i32>} : memref<16x10xf32, #tpu.memory_space<vmem>>, vector<16x10xf32>,
    return
  }
  func.func @transform_0(%arg0: i32) -> (i32, i32) {
    %c0_i32 = arith.constant 0 : i32
    %c0_i32_0 = arith.constant 0 : i32
    return %arg0, %c0_i32 : i32, i32
  }
  func.func @transform_1(%arg0: i32) -> (i32, i32) {
    %c0_i32 = arith.constant 0 : i32
    %c0_i32_0 = arith.constant 0 : i32
    %c0_i32_1 = arith.constant 0 : i32
    return %c0_i32, %c0_i32_0 : i32, i32
  }
  func.func @transform_2(%arg0: i32) -> (i32, i32) {
    %c0_i32 = arith.constant 0 : i32
    %c0_i32_0 = arith.constant 0 : i32
    %c0_i32_1 = arith.constant 0 : i32
    return %c0_i32, %c0_i32_0 : i32, i32
  }
  func.func @transform_3(%arg0: i32) -> (i32, i32) {
    %c0_i32 = arith.constant 0 : i32
    %c0_i32_0 = arith.constant 0 : i32
    %c0_i32_1 = arith.constant 0 : i32
    return %c0_i32, %c0_i32_0 : i32, i32
  }
  func.func @transform_4(%arg0: i32) -> (i32, i32) {
    %c0_i32 = arith.constant 0 : i32
    %c0_i32_0 = arith.constant 0 : i32
    %c0_i32_1 = arith.constant 0 : i32
    return %c0_i32, %c0_i32_0 : i32, i32
  }
  func.func @transform_5(%arg0: i32) -> (i32, i32) {
    %c0_i32 = arith.constant 0 : i32
    %c0_i32_0 = arith.constant 0 : i32
    %c0_i32_1 = arith.constant 0 : i32
    return %c0_i32, %c0_i32_0 : i32, i32
  }
  func.func @transform_6(%arg0: i32) -> (i32, i32) {
    %c0_i32 = arith.constant 0 : i32
    %c0_i32_0 = arith.constant 0 : i32
    %c0_i32_1 = arith.constant 0 : i32
    return %c0_i32, %c0_i32_0 : i32, i32
  }
  func.func @transform_7(%arg0: i32) -> (i32, i32) {
    %c0_i32 = arith.constant 0 : i32
    %c0_i32_0 = arith.constant 0 : i32
    return %arg0, %c0_i32 : i32, i32
  }
}

</mosaic_0001>

<bundles_post_ra>
// kernel: _net_forward_padded.1
= control target key start
LH: loop header
LB: loop body
LE: loop exit
PB: predicated region body
PF: predicated region fallthrough
CT: control target
= control target key end

     0   :  { %12 = vsyncpa [#allocation3], 0  ;;  %s3688_s0 = inlined_call_operand.hbm [shape: bf16[16,784], index: 0, kind: input, shape index: {}]   ;;  %s3689_s1 = inlined_call_operand.hbm [shape: bf16[784,512], index: 1, kind: input, shape index: {}]   ;;  %s3690_s2 = inlined_call_operand.hbm [shape: bf16[512,256], index: 2, kind: input, shape index: {}]   ;;  %s3691_s3 = inlined_call_operand.vmem [shape: bf16[256,128], index: 3, kind: input, shape index: {}]   ;;  %s3692_s4 = inlined_call_operand.vmem [shape: bf16[128,64], index: 4, kind: input, shape index: {}]   ;;  %s3693_s5 = inlined_call_operand.vmem [shape: bf16[64,10], index: 5, kind: input, shape index: {}]   ;;  %s3694_s6 = inlined_call_operand.hbm [shape: f32[8,512], index: 6, kind: input, shape index: {}]   ;;  %s3695_s7 = inlined_call_operand.hbm [shape: f32[16,10], index: 7, kind: output, shape index: {}]  }
   0x1   :  { %13 = vsyncpa [#allocation6], 0 }
   0x2   :  { %14 = vsyncpa [#allocation9], 0 }
   0x3   :  { %15 = vsyncpa [#allocation4], 0  ;;  %s3469_s24 = smov [#allocation5]  }
   0x4   :  { %s33_s25 = sshll.u32 %s3469_s24, 4  ;;  %s34_s25 = int_to_ptr.vmem [resolvable:$true] %s33_s25 }
   0x5   :  { %s3369_s26 = scalar_lea.vmem %s34_s25, 25088  ;;  %p3374_p1 = scmp.lt.s32.totalorder %s34_s25, %s34_s25 }
   0x6   :  { %p3370_p0 = scmp.ne.s32.totalorder %s34_s25, %s3369_s26  ;;  %p3375_p2 = scmp.lt.s32.totalorder %s3369_s26, %s3369_s26 }
   0x8   :  { %p3376_p3 = por %p3375_p2, %p3374_p1 }
   0xa   :  { %p3377_p4 = pnand %p3376_p3, %p3370_p0 }
   0xc   :  { %3380 = shalt.err (!%p3377_p4)
}
   0xd   :  { %s3470_s27 = smov 256   ;;  %s3471_s28 = smov 16  }
   0xe   :  { %39 = dma.hbm_to_vmem [thread:$0]  %s3689_s1, 25088, %s34_s25, [#allocation6], %s3470_s27, %s3470_s27, %s3471_s28  }
   0xf   :  { %s3472_s8 = smov [#allocation2]  }
  0x10   :  { %s21_s9 = sshll.u32 %s3472_s8, 4  ;;  %s22_s9 = int_to_ptr.vmem [resolvable:$true] %s21_s9 }
  0x11   :  { %s3389_s10 = scalar_lea.vmem %s22_s9, 896  ;;  %p3394_p6 = scmp.lt.s32.totalorder %s22_s9, %s22_s9 }
  0x12   :  { %p3390_p5 = scmp.ne.s32.totalorder %s22_s9, %s3389_s10  ;;  %p3395_p7 = scmp.lt.s32.totalorder %s3389_s10, %s3389_s10 }
  0x14   :  { %p3396_p8 = por %p3395_p7, %p3394_p6 }
  0x16   :  { %p3397_p9 = pnand %p3396_p8, %p3390_p5 }
  0x18   :  { %3400 = shalt.err (!%p3397_p9)
}
  0x19   :  { %s3473_s11 = smov 448   ;;  %s3474_s12 = smov 28  }
  0x1a   :  { %27 = dma.hbm_to_vmem [thread:$0]  %s3688_s0, 896, %s22_s9, [#allocation3], %s3473_s11, %s3473_s11, %s3474_s12  }
  0x1b   :  { %s3475_s15 = smov [#allocation7]  }
  0x1c   :  { %s45_s16 = sshll.u32 %s3475_s15, 4  ;;  %s46_s16 = int_to_ptr.vmem [resolvable:$true] %s45_s16 }
  0x1d   :  { %s3409_s1 = scalar_lea.vmem %s46_s16, 8192  ;;  %p3414_p11 = scmp.lt.s32.totalorder %s46_s16, %s46_s16 }
  0x1e   :  { %p3410_p10 = scmp.ne.s32.totalorder %s46_s16, %s3409_s1  ;;  %p3415_p12 = scmp.lt.s32.totalorder %s3409_s1, %s3409_s1 }
  0x20   :  { %p3416_p13 = por %p3415_p12, %p3414_p11 }
  0x22   :  { %p3417_p0 = pnand %p3416_p13, %p3410_p10 }
  0x24   :  { %3420 = shalt.err (!%p3417_p0)
}
  0x25   :  { %s3476_s17 = smov 128   ;;  %s3477_s18 = smov 8  }
  0x26   :  { %51 = dma.hbm_to_vmem [thread:$0]  %s3690_s2, 8192, %s46_s16, [#allocation6], %s3476_s17, %s3476_s17, %s3477_s18  }
  0x27   :  { %s3478_s0 = smov [#allocation8]  }
  0x28   :  { %s64_s21 = sshll.u32 %s3478_s0, 4  ;;  %s65_s21 = int_to_ptr.vmem [resolvable:$true] %s64_s21 }
  0x29   :  { %s3429_s22 = scalar_lea.vmem %s65_s21, 512  ;;  %p3434_p2 = scmp.lt.s32.totalorder %s65_s21, %s65_s21 }
  0x2a   :  { %p3430_p1 = scmp.ne.s32.totalorder %s65_s21, %s3429_s22  ;;  %p3435_p3 = scmp.lt.s32.totalorder %s3429_s22, %s3429_s22 }
  0x2c   :  { %p3436_p4 = por %p3435_p3, %p3434_p2 }
  0x2e   :  { %p3437_p5 = pnand %p3436_p4, %p3430_p1 }
  0x30   :  { %3440 = shalt.err (!%p3437_p5)
}
  0x31   :  { %67 = dma.hbm_to_vmem [thread:$0]  %s3694_s6, 512, %s65_s21, [#allocation9]  }
  0x32   :  { %3461 = dma.done.wait [#allocation3], 896  }
  0x33   :  { %3462 = vsyncadd [#allocation3], 4294966400 }
  0x34   :  { %3463 = dma.done.wait [#allocation6], 33280  }
  0x35   :  { %3464 = vsyncadd [#allocation6], 4294934016 }
  0x36   :  { %3465 = dma.done.wait [#allocation9], 512  }
  0x37   :  { %3466 = vsyncadd [#allocation9], 4294966784  ;;  %v2933_v0 = vld [vmem:[#allocation5 + $0xe4] ss:$16 sps:$4 sm:$0xff]   ;;  %v2937_v2 = vld [vmem:[#allocation5 + $0xe0] ss:$16 sps:$4 sm:$0xff]  }
  0x38   :  { %v2935_v1 = vld [vmem:[#allocation5 + $0x2e4] ss:$16 sps:$4 sm:$0xff]   ;;  %1326 = vmatprep.subr.bf16.mxu0 %v2933_v0  ;;  %v2938_v3 = vld [vmem:[#allocation5 + $0x2e0] ss:$16 sps:$4 sm:$0xff]   ;;  %v3538_v49 = vld [vmem:[#allocation2 + $0x4] ss:$28 sps:$4 sm:$0xff]  }
  0x39   :  { %1369 = vmatprep.subr.bf16.mxu1 %v2935_v1  ;;  %v2939_v4 = vld [vmem:[#allocation5 + $0xc4] ss:$16 sps:$4 sm:$0xff]   ;;  %1327 = vmatpush1.bf16.msra.mxu0 %v2937_v2  ;;  %v2943_v6 = vld [vmem:[#allocation5 + $0xc0] ss:$16 sps:$4 sm:$0xff]   ;;  %vm1322_vm0 = vcmask 130048   ;;  %vm3481_vm1 = vmmov 0  }
  0x3a   :  { %1370 = vmatpush1.bf16.msra.mxu1 %v2938_v3  ;;  %v2941_v5 = vld [vmem:[#allocation5 + $0x2c4] ss:$16 sps:$4 sm:$0xff]   ;;  %1328 = vmatprep.subr.bf16.mxu0 %v2939_v4  ;;  %v2944_v7 = vld [vmem:[#allocation5 + $0x2c0] ss:$16 sps:$4 sm:$0xff]   ;;  %vm2486_vm2 = vcmask 523264   ;;  %vm2531_vm3 = vcmask 80896  }
  0x3b   :  { %1371 = vmatprep.subr.bf16.mxu1 %v2941_v5  ;;  %v2945_v8 = vld [vmem:[#allocation5 + $0xa4] ss:$16 sps:$4 sm:$0xff]   ;;  %v2949_v10 = vld [vmem:[#allocation5 + $0xa0] ss:$16 sps:$4 sm:$0xff]   ;;  %1358 = vmatprep.mubr.bf16.mxu0 %v3538_v49  ;;  %s3482_s27 = smov [#allocation10]  }
  0x3c   :  { %v2947_v9 = vld [vmem:[#allocation5 + $0x2a4] ss:$16 sps:$4 sm:$0xff]   ;;  %v2950_v11 = vld [vmem:[#allocation5 + $0x2a0] ss:$16 sps:$4 sm:$0xff]  }
  0x3d   :  { %1329 = vmatpush1.bf16.msra.mxu0 %v2943_v6  ;;  %v2951_v12 = vld [vmem:[#allocation5 + $0x84] ss:$16 sps:$4 sm:$0xff]   ;;  %v2955_v14 = vld [vmem:[#allocation5 + $0x80] ss:$16 sps:$4 sm:$0xff]  }
  0x3e   :  { %1372 = vmatpush1.bf16.msra.mxu1 %v2944_v7  ;;  %1330 = vmatprep.subr.bf16.mxu0 %v2945_v8  ;;  %v2953_v13 = vld [vmem:[#allocation5 + $0x284] ss:$16 sps:$4 sm:$0xff]   ;;  %v2956_v15 = vld [vmem:[#allocation5 + $0x280] ss:$16 sps:$4 sm:$0xff]  }
  0x3f   :  { %1373 = vmatprep.subr.bf16.mxu1 %v2947_v9  ;;  %v2957_v16 = vld [vmem:[#allocation5 + $0x64] ss:$16 sps:$4 sm:$0xff]   ;;  %v2961_v18 = vld [vmem:[#allocation5 + $0x60] ss:$16 sps:$4 sm:$0xff]   ;;  %v3046_v9 = vld [vmem:[#allocation5 + $0xec] ss:$16 sps:$4 sm:$0xff]  }
  0x40   :  { %v2959_v17 = vld [vmem:[#allocation5 + $0x264] ss:$16 sps:$4 sm:$0xff]   ;;  %v2962_v19 = vld [vmem:[#allocation5 + $0x260] ss:$16 sps:$4 sm:$0xff]  }
  0x41   :  { %1331 = vmatpush1.bf16.msra.mxu0 %v2949_v10  ;;  %v2963_v20 = vld [vmem:[#allocation5 + $0x44] ss:$16 sps:$4 sm:$0xff]   ;;  %v2967_v22 = vld [vmem:[#allocation5 + $0x40] ss:$16 sps:$4 sm:$0xff]  }
  0x42   :  { %1374 = vmatpush1.bf16.msra.mxu1 %v2950_v11  ;;  %1332 = vmatprep.subr.bf16.mxu0 %v2951_v12  ;;  %v2965_v21 = vld [vmem:[#allocation5 + $0x244] ss:$16 sps:$4 sm:$0xff]   ;;  %v2968_v23 = vld [vmem:[#allocation5 + $0x240] ss:$16 sps:$4 sm:$0xff]   ;;  %v3479_v11 = vmov 0  }
  0x43   :  { %1375 = vmatprep.subr.bf16.mxu1 %v2953_v13  ;;  %v2969_v24 = vld [vmem:[#allocation5 + $0x24] ss:$16 sps:$4 sm:$0xff]   ;;  %v2973_v26 = vld [vmem:[#allocation5 + $0x20] ss:$16 sps:$4 sm:$0xff]   ;;  %v3044_v13 = vld [vmem:[#allocation5 + $0xe8] ss:$16 sps:$4 sm:$0xff]  }
  0x44   :  { %v2971_v25 = vld [vmem:[#allocation5 + $0x224] ss:$16 sps:$4 sm:$0xff]   ;;  %v2974_v27 = vld [vmem:[#allocation5 + $0x220] ss:$16 sps:$4 sm:$0xff]  }
  0x45   :  { %1333 = vmatpush1.bf16.msra.mxu0 %v2955_v14  ;;  %v2975_v28 = vld [vmem:[#allocation5 + $0x4] ss:$16 sps:$4 sm:$0xff]   ;;  %v2979_v30 = vld [vmem:[#allocation5] ss:$16 sps:$4 sm:$0xff]  }
  0x46   :  { %1376 = vmatpush1.bf16.msra.mxu1 %v2956_v15  ;;  %1334 = vmatprep.subr.bf16.mxu0 %v2957_v16  ;;  %v2977_v29 = vld [vmem:[#allocation5 + $0x204] ss:$16 sps:$4 sm:$0xff]   ;;  %v2980_v31 = vld [vmem:[#allocation5 + $0x200] ss:$16 sps:$4 sm:$0xff]   ;;  %v3053_v16 = vld [vmem:[#allocation5 + $0xcc] ss:$16 sps:$4 sm:$0xff]  }
  0x47   :  { %1377 = vmatprep.subr.bf16.mxu1 %v2959_v17  ;;  %v2981_v32 = vld [vmem:[#allocation5 + $0x1e4] ss:$16 sps:$4 sm:$0xff]   ;;  %v2985_v34 = vld [vmem:[#allocation5 + $0x1e0] ss:$16 sps:$4 sm:$0xff]  }
  0x48   :  { %v2983_v33 = vld [vmem:[#allocation5 + $0x3e4] ss:$16 sps:$4 sm:$0xff]   ;;  %v2986_v35 = vld [vmem:[#allocation5 + $0x3e0] ss:$16 sps:$4 sm:$0xff]  }
  0x49   :  { %1335 = vmatpush1.bf16.msra.mxu0 %v2961_v18  ;;  %v2987_v36 = vld [vmem:[#allocation5 + $0x1c4] ss:$16 sps:$4 sm:$0xff]   ;;  %v2991_v38 = vld [vmem:[#allocation5 + $0x1c0] ss:$16 sps:$4 sm:$0xff]   ;;  %v3051_v18 = vld [vmem:[#allocation5 + $0xc8] ss:$16 sps:$4 sm:$0xff]  }
  0x4a   :  { %1378 = vmatpush1.bf16.msra.mxu1 %v2962_v19  ;;  %1336 = vmatprep.subr.bf16.mxu0 %v2963_v20  ;;  %v2989_v37 = vld [vmem:[#allocation5 + $0x3c4] ss:$16 sps:$4 sm:$0xff]   ;;  %v2992_v39 = vld [vmem:[#allocation5 + $0x3c0] ss:$16 sps:$4 sm:$0xff]   ;;  %v3059_v20 = vld [vmem:[#allocation5 + $0xac] ss:$16 sps:$4 sm:$0xff]  }
  0x4b   :  { %1379 = vmatprep.subr.bf16.mxu1 %v2965_v21  ;;  %v2993_v40 = vld [vmem:[#allocation5 + $0x1a4] ss:$16 sps:$4 sm:$0xff]   ;;  %v2997_v42 = vld [vmem:[#allocation5 + $0x1a0] ss:$16 sps:$4 sm:$0xff]  }
  0x4c   :  { %v2995_v41 = vld [vmem:[#allocation5 + $0x3a4] ss:$16 sps:$4 sm:$0xff]   ;;  %v2998_v43 = vld [vmem:[#allocation5 + $0x3a0] ss:$16 sps:$4 sm:$0xff]  }
  0x4d   :  { %1337 = vmatpush1.bf16.msra.mxu0 %v2967_v22  ;;  %v2999_v44 = vld [vmem:[#allocation5 + $0x184] ss:$16 sps:$4 sm:$0xff]   ;;  %v3003_v46 = vld [vmem:[#allocation5 + $0x180] ss:$16 sps:$4 sm:$0xff]   ;;  %v3057_v22 = vld [vmem:[#allocation5 + $0xa8] ss:$16 sps:$4 sm:$0xff]  }
  0x4e   :  { %1380 = vmatpush1.bf16.msra.mxu1 %v2968_v23  ;;  %1338 = vmatprep.subr.bf16.mxu0 %v2969_v24  ;;  %v3001_v45 = vld [vmem:[#allocation5 + $0x384] ss:$16 sps:$4 sm:$0xff]   ;;  %v3004_v47 = vld [vmem:[#allocation5 + $0x380] ss:$16 sps:$4 sm:$0xff]   ;;  %v3065_v24 = vld [vmem:[#allocation5 + $0x8c] ss:$16 sps:$4 sm:$0xff]  }
  0x4f   :  { %1381 = vmatprep.subr.bf16.mxu1 %v2971_v25  ;;  %v3005_v48 = vld [vmem:[#allocation5 + $0x164] ss:$16 sps:$4 sm:$0xff]   ;;  %v3009_v52 = vld [vmem:[#allocation5 + $0x160] ss:$16 sps:$4 sm:$0xff]  }
  0x50   :  { %v3007_v50 = vld [vmem:[#allocation5 + $0x364] ss:$16 sps:$4 sm:$0xff]   ;;  %v3010_v53 = vld [vmem:[#allocation5 + $0x360] ss:$16 sps:$4 sm:$0xff]  }
  0x51   :  { %1339 = vmatpush1.bf16.msra.mxu0 %v2973_v26  ;;  %v3540_v51 = vld [vmem:[#allocation2 + $0xc] ss:$28 sps:$4 sm:$0xff]   ;;  %v3544_v4 = vld [vmem:[#allocation2] ss:$28 sps:$4 sm:$0xff]   ;;  %v3551_v14 = vld [vmem:[#allocation2 + $0x18] ss:$28 sps:$4 sm:$0xff]  }
  0x52   :  { %1382 = vmatpush1.bf16.msra.mxu1 %v2974_v27  ;;  %1340 = vmatprep.subr.bf16.mxu0 %v2975_v28  ;;  %v3011_v54 = vld [vmem:[#allocation5 + $0x144] ss:$16 sps:$4 sm:$0xff]   ;;  %v3015_v56 = vld [vmem:[#allocation5 + $0x140] ss:$16 sps:$4 sm:$0xff]   ;;  %v3063_v26 = vld [vmem:[#allocation5 + $0x88] ss:$16 sps:$4 sm:$0xff]  }
  0x53   :  { %1383 = vmatprep.subr.bf16.mxu1 %v2977_v29  ;;  %1401 = vmatprep.mubr.bf16.mxu1 %v3540_v51  ;;  %v3013_v55 = vld [vmem:[#allocation5 + $0x344] ss:$16 sps:$4 sm:$0xff]   ;;  %v3016_v57 = vld [vmem:[#allocation5 + $0x340] ss:$16 sps:$4 sm:$0xff]   ;;  %v3071_v28 = vld [vmem:[#allocation5 + $0x6c] ss:$16 sps:$4 sm:$0xff]  }
  0x54   :  { %v3017_v58 = vld [vmem:[#allocation5 + $0x124] ss:$16 sps:$4 sm:$0xff]   ;;  %v3021_v60 = vld [vmem:[#allocation5 + $0x120] ss:$16 sps:$4 sm:$0xff]  }
  0x55   :  { %1341 = vmatpush1.bf16.msra.mxu0 %v2979_v30  ;;  %v3019_v59 = vld [vmem:[#allocation5 + $0x324] ss:$16 sps:$4 sm:$0xff]   ;;  %v3022_v61 = vld [vmem:[#allocation5 + $0x320] ss:$16 sps:$4 sm:$0xff]   ;;  %v3069_v30 = vld [vmem:[#allocation5 + $0x68] ss:$16 sps:$4 sm:$0xff]  }
  0x56   :  { %1384 = vmatpush1.bf16.msra.mxu1 %v2980_v31  ;;  %1342 = vmatprep.subr.bf16.mxu0 %v2981_v32  ;;  %v3023_v62 = vld [vmem:[#allocation5 + $0x104] ss:$16 sps:$4 sm:$0xff]   ;;  %v3027_v0 = vld [vmem:[#allocation5 + $0x100] ss:$16 sps:$4 sm:$0xff]   ;;  %v3077_v32 = vld [vmem:[#allocation5 + $0x4c] ss:$16 sps:$4 sm:$0xff]  }
  0x57   :  { %1385 = vmatprep.subr.bf16.mxu1 %v2983_v33  ;;  %v3025_v63 = vld [vmem:[#allocation5 + $0x304] ss:$16 sps:$4 sm:$0xff]   ;;  %v3028_v1 = vld [vmem:[#allocation5 + $0x300] ss:$16 sps:$4 sm:$0xff]   ;;  %v3556_v33 = vld [vmem:[#allocation2 + $0x14] ss:$28 sps:$4 sm:$0xff]  }
  0x58   :  { %v3037_v2 = vld [vmem:[#allocation5 + $0x4e4] ss:$16 sps:$4 sm:$0xff]   ;;  %v3546_v5 = vld [vmem:[#allocation2 + $0x8] ss:$28 sps:$4 sm:$0xff]  }
  0x59   :  { %1343 = vmatpush2.bf16.msra.mxu0 %v2985_v34  ;;  %v3040_v3 = vld [vmem:[#allocation5 + $0x604] ss:$16 sps:$4 sm:$0xff]   ;;  %v3035_v6 = vld [vmem:[#allocation5 + $0x4e0] ss:$16 sps:$4 sm:$0xff]  }
  0x5a   :  { %1386 = vmatpush2.bf16.msra.mxu1 %v2986_v35  ;;  %1344 = vmatprep.subr.bf16.mxu0 %v2987_v36  ;;  %v3038_v7 = vld [vmem:[#allocation5 + $0x600] ss:$16 sps:$4 sm:$0xff]   ;;  %v3043_v8 = vld [vmem:[#allocation5 + $0x4c4] ss:$16 sps:$4 sm:$0xff]   ;;  %v3075_v35 = vld [vmem:[#allocation5 + $0x48] ss:$16 sps:$4 sm:$0xff]  }
  0x5b   :  { %1387 = vmatprep.subr.bf16.mxu1 %v2989_v37  ;;  %v3041_v10 = vld [vmem:[#allocation5 + $0x4c0] ss:$16 sps:$4 sm:$0xff]   ;;  %v3049_v12 = vld [vmem:[#allocation5 + $0x4a4] ss:$16 sps:$4 sm:$0xff]   ;;  %v3083_v37 = vld [vmem:[#allocation5 + $0x2c] ss:$16 sps:$4 sm:$0xff]  }
  0x5c   :  { %v3047_v15 = vld [vmem:[#allocation5 + $0x4a0] ss:$16 sps:$4 sm:$0xff]   ;;  %v3056_v17 = vld [vmem:[#allocation5 + $0x484] ss:$16 sps:$4 sm:$0xff]  }
  0x5d   :  { %1345 = vmatpush2.bf16.msra.mxu0 %v2991_v38  ;;  %v3054_v19 = vld [vmem:[#allocation5 + $0x480] ss:$16 sps:$4 sm:$0xff]   ;;  %v3062_v21 = vld [vmem:[#allocation5 + $0x464] ss:$16 sps:$4 sm:$0xff]  }
  0x5e   :  { %1388 = vmatpush2.bf16.msra.mxu1 %v2992_v39  ;;  %1346 = vmatprep.subr.bf16.mxu0 %v2993_v40  ;;  %v3060_v23 = vld [vmem:[#allocation5 + $0x460] ss:$16 sps:$4 sm:$0xff]   ;;  %v3068_v25 = vld [vmem:[#allocation5 + $0x444] ss:$16 sps:$4 sm:$0xff]   ;;  %v3081_v39 = vld [vmem:[#allocation5 + $0x28] ss:$16 sps:$4 sm:$0xff]  }
  0x5f   :  { %1389 = vmatprep.subr.bf16.mxu1 %v2995_v41  ;;  %v3066_v27 = vld [vmem:[#allocation5 + $0x440] ss:$16 sps:$4 sm:$0xff]   ;;  %v3074_v29 = vld [vmem:[#allocation5 + $0x424] ss:$16 sps:$4 sm:$0xff]   ;;  %v3089_v41 = vld [vmem:[#allocation5 + $0xc] ss:$16 sps:$4 sm:$0xff]  }
  0x60   :  { %v3072_v31 = vld [vmem:[#allocation5 + $0x420] ss:$16 sps:$4 sm:$0xff]   ;;  %v3080_v34 = vld [vmem:[#allocation5 + $0x404] ss:$16 sps:$4 sm:$0xff]  }
  0x61   :  { %1347 = vmatpush2.bf16.msra.mxu0 %v2997_v42  ;;  %v3078_v36 = vld [vmem:[#allocation5 + $0x400] ss:$16 sps:$4 sm:$0xff]   ;;  %v3086_v38 = vld [vmem:[#allocation5 + $0x5e4] ss:$16 sps:$4 sm:$0xff]  }
  0x62   :  { %1390 = vmatpush2.bf16.msra.mxu1 %v2998_v43  ;;  %1348 = vmatprep.subr.bf16.mxu0 %v2999_v44  ;;  %v3084_v40 = vld [vmem:[#allocation5 + $0x5e0] ss:$16 sps:$4 sm:$0xff]   ;;  %v3092_v42 = vld [vmem:[#allocation5 + $0x5c4] ss:$16 sps:$4 sm:$0xff]   ;;  %v3087_v43 = vld [vmem:[#allocation5 + $0x8] ss:$16 sps:$4 sm:$0xff]  }
  0x63   :  { %1391 = vmatprep.subr.bf16.mxu1 %v3001_v45  ;;  %v3090_v44 = vld [vmem:[#allocation5 + $0x5c0] ss:$16 sps:$4 sm:$0xff]   ;;  %v3095_v45 = vld [vmem:[#allocation5 + $0x1ec] ss:$16 sps:$4 sm:$0xff]  }
  0x65   :  { %1349 = vmatpush2.bf16.msra.mxu0 %v3003_v46  ;;  %v3098_v46 = vld [vmem:[#allocation5 + $0x5a4] ss:$16 sps:$4 sm:$0xff]  }
  0x66   :  { %1392 = vmatpush2.bf16.msra.mxu1 %v3004_v47  ;;  %1350 = vmatprep.subr.bf16.mxu0 %v3005_v48  ;;  %v3093_v47 = vld [vmem:[#allocation5 + $0x1e8] ss:$16 sps:$4 sm:$0xff]   ;;  %v3096_v48 = vld [vmem:[#allocation5 + $0x5a0] ss:$16 sps:$4 sm:$0xff]  }
  0x67   :  { %1393 = vmatprep.subr.bf16.mxu1 %v3007_v50  ;;  %v3104_v50 = vld [vmem:[#allocation5 + $0x584] ss:$16 sps:$4 sm:$0xff]  }
  0x69   :  { %1351 = vmatpush2.bf16.msra.mxu0 %v3009_v52  ;;  %v3099_v52 = vld [vmem:[#allocation5 + $0x1c8] ss:$16 sps:$4 sm:$0xff]  }
  0x6a   :  { %1394 = vmatpush2.bf16.msra.mxu1 %v3010_v53  ;;  %1352 = vmatprep.subr.bf16.mxu0 %v3011_v54  ;;  %v3102_v53 = vld [vmem:[#allocation5 + $0x580] ss:$16 sps:$4 sm:$0xff]   ;;  %v3107_v54 = vld [vmem:[#allocation5 + $0x1ac] ss:$16 sps:$4 sm:$0xff]  }
  0x6b   :  { %1395 = vmatprep.subr.bf16.mxu1 %v3013_v55  ;;  %v3110_v55 = vld [vmem:[#allocation5 + $0x564] ss:$16 sps:$4 sm:$0xff]  }
  0x6d   :  { %1353 = vmatpush2.bf16.msra.mxu0 %v3015_v56  ;;  %v3105_v56 = vld [vmem:[#allocation5 + $0x1a8] ss:$16 sps:$4 sm:$0xff]  }
  0x6e   :  { %1396 = vmatpush2.bf16.msra.mxu1 %v3016_v57  ;;  %1354 = vmatprep.subr.bf16.mxu0 %v3017_v58  ;;  %v3108_v57 = vld [vmem:[#allocation5 + $0x560] ss:$16 sps:$4 sm:$0xff]   ;;  %v3113_v58 = vld [vmem:[#allocation5 + $0x18c] ss:$16 sps:$4 sm:$0xff]  }
  0x6f   :  { %1397 = vmatprep.subr.bf16.mxu1 %v3019_v59  ;;  %v3116_v59 = vld [vmem:[#allocation5 + $0x544] ss:$16 sps:$4 sm:$0xff]  }
  0x71   :  { %1355 = vmatpush2.bf16.msra.mxu0 %v3021_v60  ;;  %v3111_v60 = vld [vmem:[#allocation5 + $0x188] ss:$16 sps:$4 sm:$0xff]  }
  0x72   :  { %1398 = vmatpush2.bf16.msra.mxu1 %v3022_v61  ;;  %1356 = vmatprep.subr.bf16.mxu0 %v3023_v62  ;;  %v3114_v61 = vld [vmem:[#allocation5 + $0x540] ss:$16 sps:$4 sm:$0xff]   ;;  %v3119_v62 = vld [vmem:[#allocation5 + $0x16c] ss:$16 sps:$4 sm:$0xff]  }
  0x73   :  { %1399 = vmatprep.subr.bf16.mxu1 %v3025_v63  ;;  %v3122_v63 = vld [vmem:[#allocation5 + $0x524] ss:$16 sps:$4 sm:$0xff]  }
  0x75   :  { %1357 = vmatpush2.bf16.msra.mxu0 %v3027_v0  ;;  %v3117_v0 = vld [vmem:[#allocation5 + $0x168] ss:$16 sps:$4 sm:$0xff]  }
  0x76   :  { %1400 = vmatpush2.bf16.msra.mxu1 %v3028_v1  ;;  %1412 = vmatprep.subr.bf16.mxu0 %v3037_v2  ;;  %v3120_v1 = vld [vmem:[#allocation5 + $0x520] ss:$16 sps:$4 sm:$0xff]   ;;  %v3125_v2 = vld [vmem:[#allocation5 + $0x14c] ss:$16 sps:$4 sm:$0xff]  }
  0x77   :  { %1469 = vmatprep.subr.bf16.mxu1 %v3040_v3  ;;  %v3128_v3 = vld [vmem:[#allocation5 + $0x504] ss:$16 sps:$4 sm:$0xff]  }
  0x78   :  { %1359 = vmatmul.mubr.bf16.vlgmr.msra.gmra.mxu0 %v3544_v4 }
  0x79   :  { %1402 = vmatmul.mubr.bf16.vlgmr.msra.gmra.mxu1 %v3546_v5  ;;  %1413 = vmatpush1.bf16.msra.mxu0 %v3035_v6  ;;  %v3123_v6 = vld [vmem:[#allocation5 + $0x148] ss:$16 sps:$4 sm:$0xff]  }
  0x7a   :  { %1470 = vmatpush1.bf16.msra.mxu1 %v3038_v7  ;;  %1414 = vmatprep.subr.bf16.mxu0 %v3043_v8  ;;  %v3126_v7 = vld [vmem:[#allocation5 + $0x500] ss:$16 sps:$4 sm:$0xff]   ;;  %v3134_v8 = vld [vmem:[#allocation5 + $0x12c] ss:$16 sps:$4 sm:$0xff]  }
  0x7b   :  { %1487 = vmatprep.mubr.bf16.mxu1 %v3479_v11  ;;  %1498 = vmatprep.subr.bf16.mxu1 %v3046_v9  ;;  %v3137_v9 = vld [vmem:[#allocation5 + $0x2ec] ss:$16 sps:$4 sm:$0xff]  }
  0x7c   :  { %1444 = vmatprep.mubr.bf16.mxu0 %v3556_v33 }
  0x7d   :  { %1415 = vmatpush1.bf16.msra.mxu0 %v3041_v10  ;;  %v3559_v10 = vld [vmem:[#allocation2 + $0x10] ss:$28 sps:$4 sm:$0xff]  }
  0x7e   :  { %1416 = vmatprep.subr.bf16.mxu0 %v3049_v12  ;;  %v3132_v12 = vld [vmem:[#allocation5 + $0x128] ss:$16 sps:$4 sm:$0xff]  }
  0x81   :  { %2756 = vmatmul.mubr.msk.bf16.vlgmr.msra.gmra.mxu1 %vm1322_vm0, %v3551_v14  ;;  %1417 = vmatpush1.bf16.msra.mxu0 %v3047_v15  ;;  %v3140_v15 = vld [vmem:[#allocation5 + $0x10c] ss:$16 sps:$4 sm:$0xff]  }
  0x82   :  { %1499 = vmatpush1.bf16.msra.mxu1 %v3044_v13  ;;  %1418 = vmatprep.subr.bf16.mxu0 %v3056_v17  ;;  %v3135_v13 = vld [vmem:[#allocation5 + $0x2e8] ss:$16 sps:$4 sm:$0xff]  }
  0x83   :  { %1500 = vmatprep.subr.bf16.mxu1 %v3053_v16  ;;  %1530 = vmatprep.mubr.bf16.mxu1 %v3538_v49  ;;  %v3101_v49 = vld [vmem:[#allocation5 + $0x1cc] ss:$16 sps:$4 sm:$0xff]   ;;  %v3138_v17 = vld [vmem:[#allocation5 + $0x108] ss:$16 sps:$4 sm:$0xff]  }
  0x84   :  { %v3143_v16 = vld [vmem:[#allocation5 + $0x2cc] ss:$16 sps:$4 sm:$0xff]  }
  0x85   :  { %1419 = vmatpush1.bf16.msra.mxu0 %v3054_v19  ;;  %v3146_v19 = vld [vmem:[#allocation5 + $0x4ec] ss:$16 sps:$4 sm:$0xff]  }
  0x86   :  { %1501 = vmatpush1.bf16.msra.mxu1 %v3051_v18  ;;  %1420 = vmatprep.subr.bf16.mxu0 %v3062_v21  ;;  %v3141_v18 = vld [vmem:[#allocation5 + $0x2c8] ss:$16 sps:$4 sm:$0xff]  }
  0x87   :  { %1502 = vmatprep.subr.bf16.mxu1 %v3059_v20  ;;  %v3149_v20 = vld [vmem:[#allocation5 + $0x2ac] ss:$16 sps:$4 sm:$0xff]   ;;  %v3144_v21 = vld [vmem:[#allocation5 + $0x4e8] ss:$16 sps:$4 sm:$0xff]  }
  0x89   :  { %1421 = vmatpush1.bf16.msra.mxu0 %v3060_v23  ;;  %v3152_v23 = vld [vmem:[#allocation5 + $0x4cc] ss:$16 sps:$4 sm:$0xff]  }
  0x8a   :  { %1503 = vmatpush1.bf16.msra.mxu1 %v3057_v22  ;;  %1422 = vmatprep.subr.bf16.mxu0 %v3068_v25  ;;  %v3147_v22 = vld [vmem:[#allocation5 + $0x2a8] ss:$16 sps:$4 sm:$0xff]  }
  0x8b   :  { %1504 = vmatprep.subr.bf16.mxu1 %v3065_v24  ;;  %v3155_v24 = vld [vmem:[#allocation5 + $0x28c] ss:$16 sps:$4 sm:$0xff]   ;;  %v3150_v25 = vld [vmem:[#allocation5 + $0x4c8] ss:$16 sps:$4 sm:$0xff]  }
  0x8d   :  { %1423 = vmatpush1.bf16.msra.mxu0 %v3066_v27  ;;  %v3158_v27 = vld [vmem:[#allocation5 + $0x4ac] ss:$16 sps:$4 sm:$0xff]  }
  0x8e   :  { %1505 = vmatpush1.bf16.msra.mxu1 %v3063_v26  ;;  %1424 = vmatprep.subr.bf16.mxu0 %v3074_v29  ;;  %v3153_v26 = vld [vmem:[#allocation5 + $0x288] ss:$16 sps:$4 sm:$0xff]  }
  0x8f   :  { %1506 = vmatprep.subr.bf16.mxu1 %v3071_v28  ;;  %v3161_v28 = vld [vmem:[#allocation5 + $0x26c] ss:$16 sps:$4 sm:$0xff]   ;;  %v3156_v29 = vld [vmem:[#allocation5 + $0x4a8] ss:$16 sps:$4 sm:$0xff]  }
  0x91   :  { %1425 = vmatpush1.bf16.msra.mxu0 %v3072_v31  ;;  %v3167_v31 = vld [vmem:[#allocation5 + $0x24c] ss:$16 sps:$4 sm:$0xff]  }
  0x92   :  { %1507 = vmatpush1.bf16.msra.mxu1 %v3069_v30  ;;  %1426 = vmatprep.subr.bf16.mxu0 %v3080_v34  ;;  %v3159_v30 = vld [vmem:[#allocation5 + $0x268] ss:$16 sps:$4 sm:$0xff]   ;;  %v3170_v34 = vld [vmem:[#allocation5 + $0x46c] ss:$16 sps:$4 sm:$0xff]  }
  0x93   :  { %1508 = vmatprep.subr.bf16.mxu1 %v3077_v32  ;;  %v3162_v32 = vld [vmem:[#allocation5 + $0x488] ss:$16 sps:$4 sm:$0xff]  }
  0x95   :  { %1427 = vmatpush1.bf16.msra.mxu0 %v3078_v36  ;;  %v3168_v36 = vld [vmem:[#allocation5 + $0x468] ss:$16 sps:$4 sm:$0xff]  }
  0x96   :  { %1509 = vmatpush1.bf16.msra.mxu1 %v3075_v35  ;;  %1428 = vmatprep.subr.bf16.mxu0 %v3086_v38  ;;  %v3173_v35 = vld [vmem:[#allocation5 + $0x22c] ss:$16 sps:$4 sm:$0xff]  }
  0x97   :  { %1510 = vmatprep.subr.bf16.mxu1 %v3083_v37  ;;  %v3171_v37 = vld [vmem:[#allocation5 + $0x228] ss:$16 sps:$4 sm:$0xff]   ;;  %v3176_v38 = vld [vmem:[#allocation5 + $0x44c] ss:$16 sps:$4 sm:$0xff]  }
  0x99   :  { %1429 = vmatpush2.bf16.msra.mxu0 %v3084_v40  ;;  %v3177_v40 = vld [vmem:[#allocation5 + $0x208] ss:$16 sps:$4 sm:$0xff]  }
  0x9a   :  { %1511 = vmatpush1.bf16.msra.mxu1 %v3081_v39  ;;  %1430 = vmatprep.subr.bf16.mxu0 %v3092_v42  ;;  %v3174_v39 = vld [vmem:[#allocation5 + $0x448] ss:$16 sps:$4 sm:$0xff]   ;;  %v3185_v42 = vld [vmem:[#allocation5 + $0x3ec] ss:$16 sps:$4 sm:$0xff]  }
  0x9b   :  { %1512 = vmatprep.subr.bf16.mxu1 %v3089_v41  ;;  %v3182_v41 = vld [vmem:[#allocation5 + $0x42c] ss:$16 sps:$4 sm:$0xff]  }
  0x9d   :  { %1431 = vmatpush2.bf16.msra.mxu0 %v3090_v44  ;;  %v3183_v44 = vld [vmem:[#allocation5 + $0x3e8] ss:$16 sps:$4 sm:$0xff]  }
  0x9e   :  { %1513 = vmatpush1.bf16.msra.mxu1 %v3087_v43  ;;  %1432 = vmatprep.subr.bf16.mxu0 %v3098_v46  ;;  %v3180_v43 = vld [vmem:[#allocation5 + $0x428] ss:$16 sps:$4 sm:$0xff]   ;;  %v3191_v46 = vld [vmem:[#allocation5 + $0x3cc] ss:$16 sps:$4 sm:$0xff]  }
  0x9f   :  { %1514 = vmatprep.subr.bf16.mxu1 %v3095_v45  ;;  %v3188_v45 = vld [vmem:[#allocation5 + $0x40c] ss:$16 sps:$4 sm:$0xff]  }
  0xa1   :  { %1433 = vmatpush2.bf16.msra.mxu0 %v3096_v48  ;;  %v3189_v48 = vld [vmem:[#allocation5 + $0x3c8] ss:$16 sps:$4 sm:$0xff]  }
  0xa2   :  { %1515 = vmatpush2.bf16.msra.mxu1 %v3093_v47  ;;  %1434 = vmatprep.subr.bf16.mxu0 %v3104_v50  ;;  %v3186_v47 = vld [vmem:[#allocation5 + $0x408] ss:$16 sps:$4 sm:$0xff]   ;;  %v3197_v50 = vld [vmem:[#allocation5 + $0x3ac] ss:$16 sps:$4 sm:$0xff]  }
  0xa3   :  { %1516 = vmatprep.subr.bf16.mxu1 %v3101_v49  ;;  %v3194_v49 = vld [vmem:[#allocation5 + $0x5ec] ss:$16 sps:$4 sm:$0xff]  }
  0xa5   :  { %1435 = vmatpush2.bf16.msra.mxu0 %v3102_v53  ;;  %v3195_v53 = vld [vmem:[#allocation5 + $0x3a8] ss:$16 sps:$4 sm:$0xff]  }
  0xa6   :  { %1517 = vmatpush2.bf16.msra.mxu1 %v3099_v52  ;;  %1436 = vmatprep.subr.bf16.mxu0 %v3110_v55  ;;  %v3192_v52 = vld [vmem:[#allocation5 + $0x5e8] ss:$16 sps:$4 sm:$0xff]   ;;  %v3203_v55 = vld [vmem:[#allocation5 + $0x38c] ss:$16 sps:$4 sm:$0xff]  }
  0xa7   :  { %1518 = vmatprep.subr.bf16.mxu1 %v3107_v54  ;;  %v3200_v54 = vld [vmem:[#allocation5 + $0x5cc] ss:$16 sps:$4 sm:$0xff]  }
  0xa9   :  { %1437 = vmatpush2.bf16.msra.mxu0 %v3108_v57  ;;  %v3201_v57 = vld [vmem:[#allocation5 + $0x388] ss:$16 sps:$4 sm:$0xff]  }
  0xaa   :  { %1519 = vmatpush2.bf16.msra.mxu1 %v3105_v56  ;;  %1438 = vmatprep.subr.bf16.mxu0 %v3116_v59  ;;  %v3198_v56 = vld [vmem:[#allocation5 + $0x5c8] ss:$16 sps:$4 sm:$0xff]   ;;  %v3209_v59 = vld [vmem:[#allocation5 + $0x36c] ss:$16 sps:$4 sm:$0xff]  }
  0xab   :  { %1520 = vmatprep.subr.bf16.mxu1 %v3113_v58  ;;  %v3206_v58 = vld [vmem:[#allocation5 + $0x5ac] ss:$16 sps:$4 sm:$0xff]  }
  0xad   :  { %1439 = vmatpush2.bf16.msra.mxu0 %v3114_v61  ;;  %v3207_v61 = vld [vmem:[#allocation5 + $0x368] ss:$16 sps:$4 sm:$0xff]  }
  0xae   :  { %1521 = vmatpush2.bf16.msra.mxu1 %v3111_v60  ;;  %1440 = vmatprep.subr.bf16.mxu0 %v3122_v63  ;;  %v3204_v60 = vld [vmem:[#allocation5 + $0x5a8] ss:$16 sps:$4 sm:$0xff]   ;;  %v3215_v63 = vld [vmem:[#allocation5 + $0x34c] ss:$16 sps:$4 sm:$0xff]  }
  0xaf   :  { %1522 = vmatprep.subr.bf16.mxu1 %v3119_v62  ;;  %v3212_v62 = vld [vmem:[#allocation5 + $0x58c] ss:$16 sps:$4 sm:$0xff]  }
  0xb1   :  { %1441 = vmatpush2.bf16.msra.mxu0 %v3120_v1  ;;  %v3213_v1 = vld [vmem:[#allocation5 + $0x348] ss:$16 sps:$4 sm:$0xff]  }
  0xb2   :  { %1523 = vmatpush2.bf16.msra.mxu1 %v3117_v0  ;;  %1442 = vmatprep.subr.bf16.mxu0 %v3128_v3  ;;  %v3210_v0 = vld [vmem:[#allocation5 + $0x588] ss:$16 sps:$4 sm:$0xff]   ;;  %v3221_v3 = vld [vmem:[#allocation5 + $0x32c] ss:$16 sps:$4 sm:$0xff]  }
  0xb3   :  { %1524 = vmatprep.subr.bf16.mxu1 %v3125_v2  ;;  %v3218_v2 = vld [vmem:[#allocation5 + $0x56c] ss:$16 sps:$4 sm:$0xff]  }
  0xb5   :  { %1443 = vmatpush2.bf16.msra.mxu0 %v3126_v7  ;;  %v3219_v7 = vld [vmem:[#allocation5 + $0x328] ss:$16 sps:$4 sm:$0xff]  }
  0xb6   :  { %1525 = vmatpush2.bf16.msra.mxu1 %v3123_v6  ;;  %1541 = vmatprep.subr.bf16.mxu0 %v3137_v9  ;;  %v3216_v6 = vld [vmem:[#allocation5 + $0x568] ss:$16 sps:$4 sm:$0xff]   ;;  %v3227_v9 = vld [vmem:[#allocation5 + $0x30c] ss:$16 sps:$4 sm:$0xff]  }
  0xb7   :  { %1526 = vmatprep.subr.bf16.mxu1 %v3134_v8  ;;  %v3224_v8 = vld [vmem:[#allocation5 + $0x54c] ss:$16 sps:$4 sm:$0xff]  }
  0xb8   :  { %1445 = vmatmul.mubr.bf16.vlgmr.msra.gmra.mxu0 %v3559_v10 }
  0xb9   :  { %1542 = vmatpush1.bf16.msra.mxu0 %v3135_v13  ;;  %1573 = vmatprep.mubr.bf16.mxu0 %v3540_v51  ;;  %v3164_v51 = vld [vmem:[#allocation5 + $0x48c] ss:$16 sps:$4 sm:$0xff]   ;;  %v3225_v13 = vld [vmem:[#allocation5 + $0x308] ss:$16 sps:$4 sm:$0xff]  }
  0xba   :  { %1527 = vmatpush2.bf16.msra.mxu1 %v3132_v12  ;;  %1543 = vmatprep.subr.bf16.mxu0 %v3143_v16  ;;  %v3222_v12 = vld [vmem:[#allocation5 + $0x548] ss:$16 sps:$4 sm:$0xff]   ;;  %v3239_v16 = vld [vmem:[#allocation7 + $0x74] ss:$8 sps:$4 sm:$0xff]  }
  0xbb   :  { %1528 = vmatprep.subr.bf16.mxu1 %v3140_v15  ;;  %v3230_v15 = vld [vmem:[#allocation5 + $0x52c] ss:$16 sps:$4 sm:$0xff]  }
  0xbd   :  { %1544 = vmatpush1.bf16.msra.mxu0 %v3141_v18  ;;  %v3237_v18 = vld [vmem:[#allocation7 + $0x70] ss:$8 sps:$4 sm:$0xff]  }
  0xbe   :  { %1529 = vmatpush2.bf16.msra.mxu1 %v3138_v17  ;;  %1545 = vmatprep.subr.bf16.mxu0 %v3149_v20  ;;  %v3228_v17 = vld [vmem:[#allocation5 + $0x528] ss:$16 sps:$4 sm:$0xff]   ;;  %v3242_v20 = vld [vmem:[#allocation7 + $0x64] ss:$8 sps:$4 sm:$0xff]  }
  0xbf   :  { %1584 = vmatprep.subr.bf16.mxu1 %v3146_v19  ;;  %v3233_v19 = vld [vmem:[#allocation5 + $0x50c] ss:$16 sps:$4 sm:$0xff]  }
  0xc1   :  { %1531 = vmatmul.mubr.bf16.vlgmr.msra.gmra.mxu1 %v3544_v4  ;;  %1546 = vmatpush1.bf16.msra.mxu0 %v3147_v22  ;;  %v3165_v4 = vld [vmem:[#allocation5 + $0x248] ss:$16 sps:$4 sm:$0xff]  }
  0xc2   :  { %1585 = vmatpush1.bf16.msra.mxu1 %v3144_v21  ;;  %1547 = vmatprep.subr.bf16.mxu0 %v3155_v24  ;;  %v3231_v21 = vld [vmem:[#allocation5 + $0x508] ss:$16 sps:$4 sm:$0xff]   ;;  %v3245_v24 = vld [vmem:[#allocation7 + $0x54] ss:$8 sps:$4 sm:$0xff]  }
  0xc3   :  { %1586 = vmatprep.subr.bf16.mxu1 %v3152_v23  ;;  %1616 = vmatprep.mubr.bf16.mxu1 %v3556_v33  ;;  %v3179_v33 = vld [vmem:[#allocation5 + $0x20c] ss:$16 sps:$4 sm:$0xff]   ;;  %v3240_v22 = vld [vmem:[#allocation7 + $0x60] ss:$8 sps:$4 sm:$0xff]  }
  0xc4   :  { %v3236_v23 = vld [vmem:[#allocation5 + $0x60c] ss:$16 sps:$4 sm:$0xff]  }
  0xc5   :  { %1548 = vmatpush1.bf16.msra.mxu0 %v3153_v26  ;;  %v3243_v26 = vld [vmem:[#allocation7 + $0x50] ss:$8 sps:$4 sm:$0xff]  }
  0xc6   :  { %1587 = vmatpush1.bf16.msra.mxu1 %v3150_v25  ;;  %1549 = vmatprep.subr.bf16.mxu0 %v3161_v28  ;;  %v3234_v25 = vld [vmem:[#allocation5 + $0x608] ss:$16 sps:$4 sm:$0xff]   ;;  %v3251_v28 = vld [vmem:[#allocation7 + $0x34] ss:$8 sps:$4 sm:$0xff]  }
  0xc7   :  { %1588 = vmatprep.subr.bf16.mxu1 %v3158_v27  ;;  %v3248_v27 = vld [vmem:[#allocation7 + $0x44] ss:$8 sps:$4 sm:$0xff]  }
  0xc9   :  { %1550 = vmatpush1.bf16.msra.mxu0 %v3159_v30  ;;  %v3254_v30 = vld [vmem:[#allocation7 + $0x24] ss:$8 sps:$4 sm:$0xff]  }
  0xca   :  { %1589 = vmatpush1.bf16.msra.mxu1 %v3156_v29  ;;  %1551 = vmatprep.subr.bf16.mxu0 %v3167_v31  ;;  %v3249_v29 = vld [vmem:[#allocation7 + $0x30] ss:$8 sps:$4 sm:$0xff]   ;;  %v3287_v31 = vld [vmem:[#allocation7 + $0x174] ss:$8 sps:$4 sm:$0xff]  }
  0xcb   :  { %1590 = vmatprep.subr.bf16.mxu1 %v3164_v51  ;;  %v3285_v51 = vld [vmem:[#allocation7 + $0x170] ss:$8 sps:$4 sm:$0xff]  }
  0xcd   :  { %1552 = vmatpush1.bf16.msra.mxu0 %v3165_v4  ;;  %v3252_v4 = vld [vmem:[#allocation7 + $0x20] ss:$8 sps:$4 sm:$0xff]  }
  0xce   :  { %1591 = vmatpush1.bf16.msra.mxu1 %v3162_v32  ;;  %1553 = vmatprep.subr.bf16.mxu0 %v3173_v35  ;;  %v3290_v32 = vld [vmem:[#allocation7 + $0x164] ss:$8 sps:$4 sm:$0xff]   ;;  %v3255_v35 = vld [vmem:[#allocation7 + $0x10] ss:$8 sps:$4 sm:$0xff]  }
  0xcf   :  { %1592 = vmatprep.subr.bf16.mxu1 %v3170_v34  ;;  %v3293_v34 = vld [vmem:[#allocation7 + $0x154] ss:$8 sps:$4 sm:$0xff]  }
  0xd1   :  { %1554 = vmatpush1.bf16.msra.mxu0 %v3171_v37  ;;  %v3291_v37 = vld [vmem:[#allocation7 + $0x150] ss:$8 sps:$4 sm:$0xff]  }
  0xd2   :  { %1593 = vmatpush1.bf16.msra.mxu1 %v3168_v36  ;;  %1555 = vmatprep.subr.bf16.mxu0 %v3179_v33  ;;  %v3260_v36 = vld [vmem:[#allocation7 + $0x4] ss:$8 sps:$4 sm:$0xff]   ;;  %v3263_v33 = vld [vmem:[#allocation7 + $0xf4] ss:$8 sps:$4 sm:$0xff]  }
  0xd3   :  { %1594 = vmatprep.subr.bf16.mxu1 %v3176_v38  ;;  %v3258_v38 = vld [vmem:[#allocation7] ss:$8 sps:$4 sm:$0xff]  }
  0xd5   :  { %1556 = vmatpush1.bf16.msra.mxu0 %v3177_v40  ;;  %v3299_v40 = vld [vmem:[#allocation7 + $0x134] ss:$8 sps:$4 sm:$0xff]  }
  0xd6   :  { %1595 = vmatpush1.bf16.msra.mxu1 %v3174_v39  ;;  %1557 = vmatprep.subr.bf16.mxu0 %v3185_v42  ;;  %v3294_v39 = vld [vmem:[#allocation7 + $0x140] ss:$8 sps:$4 sm:$0xff]   ;;  %v3266_v42 = vld [vmem:[#allocation7 + $0xe4] ss:$8 sps:$4 sm:$0xff]  }
  0xd7   :  { %1596 = vmatprep.subr.bf16.mxu1 %v3182_v41  ;;  %v3261_v41 = vld [vmem:[#allocation7 + $0xf0] ss:$8 sps:$4 sm:$0xff]  }
  0xd9   :  { %1558 = vmatpush2.bf16.msra.mxu0 %v3183_v44  ;;  %v3302_v44 = vld [vmem:[#allocation7 + $0x124] ss:$8 sps:$4 sm:$0xff]  }
  0xda   :  { %1597 = vmatpush1.bf16.msra.mxu1 %v3180_v43  ;;  %1559 = vmatprep.subr.bf16.mxu0 %v3191_v46  ;;  %v3297_v43 = vld [vmem:[#allocation7 + $0x130] ss:$8 sps:$4 sm:$0xff]   ;;  %v3269_v46 = vld [vmem:[#allocation7 + $0xd4] ss:$8 sps:$4 sm:$0xff]  }
  0xdb   :  { %1598 = vmatprep.subr.bf16.mxu1 %v3188_v45  ;;  %v3264_v45 = vld [vmem:[#allocation7 + $0xe0] ss:$8 sps:$4 sm:$0xff]  }
  0xdd   :  { %1560 = vmatpush2.bf16.msra.mxu0 %v3189_v48  ;;  %v3305_v48 = vld [vmem:[#allocation7 + $0x114] ss:$8 sps:$4 sm:$0xff]  }
  0xde   :  { %1599 = vmatpush1.bf16.msra.mxu1 %v3186_v47  ;;  %1561 = vmatprep.subr.bf16.mxu0 %v3197_v50  ;;  %v3300_v47 = vld [vmem:[#allocation7 + $0x120] ss:$8 sps:$4 sm:$0xff]   ;;  %v3272_v50 = vld [vmem:[#allocation7 + $0xc4] ss:$8 sps:$4 sm:$0xff]  }
  0xdf   :  { %1600 = vmatprep.subr.bf16.mxu1 %v3194_v49  ;;  %v3267_v49 = vld [vmem:[#allocation7 + $0xd0] ss:$8 sps:$4 sm:$0xff]  }
  0xe1   :  { %1562 = vmatpush2.bf16.msra.mxu0 %v3195_v53  ;;  %v3308_v53 = vld [vmem:[#allocation7 + $0x104] ss:$8 sps:$4 sm:$0xff]  }
  0xe2   :  { %1601 = vmatpush2.bf16.msra.mxu1 %v3192_v52  ;;  %1563 = vmatprep.subr.bf16.mxu0 %v3203_v55  ;;  %v3303_v52 = vld [vmem:[#allocation7 + $0x110] ss:$8 sps:$4 sm:$0xff]   ;;  %v3275_v55 = vld [vmem:[#allocation7 + $0xb4] ss:$8 sps:$4 sm:$0xff]  }
  0xe3   :  { %1602 = vmatprep.subr.bf16.mxu1 %v3200_v54  ;;  %v3270_v54 = vld [vmem:[#allocation7 + $0xc0] ss:$8 sps:$4 sm:$0xff]  }
  0xe5   :  { %1564 = vmatpush2.bf16.msra.mxu0 %v3201_v57  ;;  %v3311_v57 = vld [vmem:[#allocation7 + $0x1f4] ss:$8 sps:$4 sm:$0xff]  }
  0xe6   :  { %1603 = vmatpush2.bf16.msra.mxu1 %v3198_v56  ;;  %1565 = vmatprep.subr.bf16.mxu0 %v3209_v59  ;;  %v3306_v56 = vld [vmem:[#allocation7 + $0x100] ss:$8 sps:$4 sm:$0xff]   ;;  %v3278_v59 = vld [vmem:[#allocation7 + $0xa4] ss:$8 sps:$4 sm:$0xff]  }
  0xe7   :  { %1604 = vmatprep.subr.bf16.mxu1 %v3206_v58  ;;  %v3273_v58 = vld [vmem:[#allocation7 + $0xb0] ss:$8 sps:$4 sm:$0xff]  }
  0xe9   :  { %1566 = vmatpush2.bf16.msra.mxu0 %v3207_v61  ;;  %v3276_v61 = vld [vmem:[#allocation7 + $0xa0] ss:$8 sps:$4 sm:$0xff]  }
  0xea   :  { %1605 = vmatpush2.bf16.msra.mxu1 %v3204_v60  ;;  %1567 = vmatprep.subr.bf16.mxu0 %v3215_v63  ;;  %v3309_v60 = vld [vmem:[#allocation7 + $0x1f0] ss:$8 sps:$4 sm:$0xff]  }
  0xeb   :  { %1606 = vmatprep.subr.bf16.mxu1 %v3212_v62  ;;  %v3281_v62 = vld [vmem:[#allocation7 + $0x94] ss:$8 sps:$4 sm:$0xff]   ;;  %v3279_v63 = vld [vmem:[#allocation7 + $0x90] ss:$8 sps:$4 sm:$0xff]  }
  0xed   :  { %1568 = vmatpush2.bf16.msra.mxu0 %v3213_v1  ;;  %v3282_v1 = vld [vmem:[#allocation7 + $0x80] ss:$8 sps:$4 sm:$0xff]  }
  0xee   :  { %1607 = vmatpush2.bf16.msra.mxu1 %v3210_v0  ;;  %1569 = vmatprep.subr.bf16.mxu0 %v3221_v3  ;;  %v3284_v0 = vld [vmem:[#allocation7 + $0x84] ss:$8 sps:$4 sm:$0xff]   ;;  %v3312_v3 = vld [vmem:[#allocation7 + $0x1e0] ss:$8 sps:$4 sm:$0xff]  }
  0xef   :  { %1608 = vmatprep.subr.bf16.mxu1 %v3218_v2  ;;  %v3314_v2 = vld [vmem:[#allocation7 + $0x1e4] ss:$8 sps:$4 sm:$0xff]  }
  0xf1   :  { %1570 = vmatpush2.bf16.msra.mxu0 %v3219_v7  ;;  %v3315_v7 = vld [vmem:[#allocation7 + $0x1d0] ss:$8 sps:$4 sm:$0xff]  }
  0xf2   :  { %1609 = vmatpush2.bf16.msra.mxu1 %v3216_v6  ;;  %1571 = vmatprep.subr.bf16.mxu0 %v3227_v9  ;;  %v3317_v6 = vld [vmem:[#allocation7 + $0x1d4] ss:$8 sps:$4 sm:$0xff]   ;;  %v3318_v9 = vld [vmem:[#allocation7 + $0x1c0] ss:$8 sps:$4 sm:$0xff]  }
  0xf3   :  { %1610 = vmatprep.subr.bf16.mxu1 %v3224_v8  ;;  %v3320_v8 = vld [vmem:[#allocation7 + $0x1c4] ss:$8 sps:$4 sm:$0xff]  }
  0xf5   :  { %1572 = vmatpush2.bf16.msra.mxu0 %v3225_v13  ;;  %v3321_v13 = vld [vmem:[#allocation7 + $0x1b0] ss:$8 sps:$4 sm:$0xff]  }
  0xf6   :  { %1611 = vmatpush2.bf16.msra.mxu1 %v3222_v12  ;;  %2079 = vmatprep.subr.bf16.mxu0 %v3239_v16  ;;  %v3323_v12 = vld [vmem:[#allocation7 + $0x1b4] ss:$8 sps:$4 sm:$0xff]   ;;  %v3324_v16 = vld [vmem:[#allocation7 + $0x1a0] ss:$8 sps:$4 sm:$0xff]  }
  0xf7   :  { %1612 = vmatprep.subr.bf16.mxu1 %v3230_v15  ;;  %v3326_v15 = vld [vmem:[#allocation7 + $0x1a4] ss:$8 sps:$4 sm:$0xff]  }
  0xf8   :  { %1574 = vmatmul.mubr.bf16.vlgmr.msra.gmra.mxu0 %v3546_v5  ;;  %v3246_v5 = vld [vmem:[#allocation7 + $0x40] ss:$8 sps:$4 sm:$0xff]  }
  0xf9   :  { %2080 = vmatpush1.bf16.msra.mxu0 %v3237_v18  ;;  %v3327_v18 = vld [vmem:[#allocation7 + $0x190] ss:$8 sps:$4 sm:$0xff]  }
  0xfa   :  { %1613 = vmatpush2.bf16.msra.mxu1 %v3228_v17  ;;  %2081 = vmatprep.subr.bf16.mxu0 %v3242_v20  ;;  %v3329_v17 = vld [vmem:[#allocation7 + $0x194] ss:$8 sps:$4 sm:$0xff]   ;;  %v3330_v20 = vld [vmem:[#allocation7 + $0x180] ss:$8 sps:$4 sm:$0xff]  }
  0xfb   :  { %1614 = vmatprep.subr.bf16.mxu1 %v3233_v19  ;;  %v3332_v19 = vld [vmem:[#allocation7 + $0x184] ss:$8 sps:$4 sm:$0xff]  }
  0xfd   :  { %2082 = vmatpush1.bf16.msra.mxu0 %v3240_v22  ;;  %v287_v22 = vlaneseq }
  0xfe   :  { %1615 = vmatpush2.bf16.msra.mxu1 %v3231_v21  ;;  %2083 = vmatprep.subr.bf16.mxu0 %v3245_v24 }
  0xff   :  { %1641 = vmatprep.subr.bf16.mxu1 %v3236_v23  ;;  %v3570_v24 = vshrl.u32 %v287_v22, 7 }
 0x101   :  { %1617 = vmatmul.mubr.bf16.vlgmr.msra.gmra.mxu1 %v3559_v10  ;;  %2084 = vmatpush1.bf16.msra.mxu0 %v3243_v26  ;;  %v3257_v10 = vld [vmem:[#allocation7 + $0x14] ss:$8 sps:$4 sm:$0xff]  }
 0x102   :  { %1642 = vmatpush1.bf16.msra.mxu1 %v3234_v25  ;;  %1659 = vmatprep.mubr.bf16.mxu1 %v3479_v11  ;;  %v3288_v11 = vld [vmem:[#allocation7 + $0x160] ss:$8 sps:$4 sm:$0xff]  }
 0x103   :  { %2085 = vmatprep.subr.bf16.mxu0 %v3248_v27  ;;  %2122 = vmatprep.subr.bf16.mxu1 %v3287_v31  ;;  %v293_v27 = vsub.s32 1, %v3570_v24 }
 0x105   :  { %2086 = vmatpush1.bf16.msra.mxu0 %v3246_v5  ;;  %v289_v5 = vsub.s32 0, %v3570_v24 }
 0x106   :  { %2087 = vmatprep.subr.bf16.mxu0 %v3251_v28 }
 0x109   :  { %2757 = vmatmul.mubr.msk.bf16.vlgmr.msra.gmra.mxu1 %vm1322_vm0, %v3551_v14  ;;  %2088 = vmatpush1.bf16.msra.mxu0 %v3249_v29  ;;  %v3296_v14 = vld [vmem:[#allocation7 + $0x144] ss:$8 sps:$4 sm:$0xff]   ;;  %v285_v29 = vld [vmem:[#allocation8] ss:$8 sm:$0xf] }
 0x10a   :  { %2089 = vmatprep.subr.bf16.mxu0 %v3254_v30  ;;  %2123 = vmatpush1.bf16.msra.mxu1 %v3285_v51  ;;  %v294_v51 = vrot.slane %v285_v29, %v293_v27  ;;  %v290_v31 = vrot.slane %v285_v29, %v289_v5 }
 0x10b   :  { %2124 = vmatprep.subr.bf16.mxu1 %v3290_v32 }
 0x10d   :  { %2090 = vmatpush1.bf16.msra.mxu0 %v3252_v4 }
 0x10e   :  { %2091 = vmatprep.subr.bf16.mxu0 %v3257_v10  ;;  %2125 = vmatpush1.bf16.msra.mxu1 %v3288_v11 }
 0x10f   :  { %2126 = vmatprep.subr.bf16.mxu1 %v3293_v34 }
 0x111   :  { %2092 = vmatpush1.bf16.msra.mxu0 %v3255_v35 }
 0x112   :  { %2093 = vmatprep.subr.bf16.mxu0 %v3260_v36  ;;  %2127 = vmatpush1.bf16.msra.mxu1 %v3291_v37 }
 0x113   :  { %2128 = vmatprep.subr.bf16.mxu1 %v3296_v14 }
 0x115   :  { %2094 = vmatpush1.bf16.msra.mxu0 %v3258_v38 }
 0x116   :  { %2095 = vmatprep.subr.bf16.mxu0 %v3263_v33  ;;  %2129 = vmatpush1.bf16.msra.mxu1 %v3294_v39 }
 0x117   :  { %2130 = vmatprep.subr.bf16.mxu1 %v3299_v40 }
 0x119   :  { %2096 = vmatpush2.bf16.msra.mxu0 %v3261_v41 }
 0x11a   :  { %2097 = vmatprep.subr.bf16.mxu0 %v3266_v42  ;;  %2131 = vmatpush1.bf16.msra.mxu1 %v3297_v43 }
 0x11b   :  { %2132 = vmatprep.subr.bf16.mxu1 %v3302_v44 }
 0x11d   :  { %2098 = vmatpush2.bf16.msra.mxu0 %v3264_v45 }
 0x11e   :  { %2099 = vmatprep.subr.bf16.mxu0 %v3269_v46  ;;  %2133 = vmatpush1.bf16.msra.mxu1 %v3300_v47 }
 0x11f   :  { %2134 = vmatprep.subr.bf16.mxu1 %v3305_v48 }
 0x121   :  { %2100 = vmatpush2.bf16.msra.mxu0 %v3267_v49 }
 0x122   :  { %2101 = vmatprep.subr.bf16.mxu0 %v3272_v50  ;;  %2135 = vmatpush1.bf16.msra.mxu1 %v3303_v52 }
 0x123   :  { %2136 = vmatprep.subr.bf16.mxu1 %v3308_v53 }
 0x125   :  { %2102 = vmatpush2.bf16.msra.mxu0 %v3270_v54 }
 0x126   :  { %2103 = vmatprep.subr.bf16.mxu0 %v3275_v55  ;;  %2137 = vmatpush1.bf16.msra.mxu1 %v3306_v56 }
 0x127   :  { %2138 = vmatprep.subr.bf16.mxu1 %v3311_v57 }
 0x129   :  { %2104 = vmatpush2.bf16.msra.mxu0 %v3273_v58 }
 0x12a   :  { %2105 = vmatprep.subr.bf16.mxu0 %v3278_v59  ;;  %2139 = vmatpush2.bf16.msra.mxu1 %v3309_v60 }
 0x12b   :  { %2140 = vmatprep.subr.bf16.mxu1 %v3314_v2  ;;  %v301_v2 = vsub.s32 3, %v3570_v24 }
 0x12d   :  { %2106 = vmatpush2.bf16.msra.mxu0 %v3276_v61 }
 0x12e   :  { %2107 = vmatprep.subr.bf16.mxu0 %v3281_v62  ;;  %2141 = vmatpush2.bf16.msra.mxu1 %v3312_v3  ;;  %v297_v3 = vsub.s32 2, %v3570_v24 }
 0x12f   :  { %2142 = vmatprep.subr.bf16.mxu1 %v3317_v6 }
 0x131   :  { %2108 = vmatpush2.bf16.msra.mxu0 %v3279_v63 }
 0x132   :  { %2109 = vmatprep.subr.bf16.mxu0 %v3284_v0  ;;  %2143 = vmatpush2.bf16.msra.mxu1 %v3315_v7 }
 0x133   :  { %2144 = vmatprep.subr.bf16.mxu1 %v3320_v8 }
 0x135   :  { %2110 = vmatpush2.bf16.msra.mxu0 %v3282_v1 }
 0x136   :  { %2145 = vmatpush2.bf16.msra.mxu1 %v3318_v9  ;;  %v302_v9 = vrot.slane %v285_v29, %v301_v2 }
 0x137   :  { %2146 = vmatprep.subr.bf16.mxu1 %v3323_v12  ;;  %v298_v12 = vrot.slane %v285_v29, %v297_v3 }
 0x138   :  { %v1360_v25 = vpop.f32.mrf.mxu0 }
 0x139   :  { %v1403_v21 = vpop.f32.mrf.mxu1  ;;  %v1361_v11 = vadd.f32 %v1360_v25, %v290_v31 }
 0x13a   :  { %2147 = vmatpush2.bf16.msra.mxu1 %v3321_v13  ;;  %v1362_v28 = vpop.f32.mrf.mxu0 }
 0x13b   :  { %2148 = vmatprep.subr.bf16.mxu1 %v3326_v15  ;;  %v1405_v23 = vpop.f32.mrf.mxu1  ;;  %v1363_v10 = vadd.f32 %v1362_v28, %v294_v51  ;;  %v1404_v33 = vadd.f32 %v1403_v21, %v1361_v11 }
 0x13c   :  { %v1364_v32 = vpop.f32.mrf.mxu0 }
 0x13d   :  { %v1407_v26 = vpop.f32.mrf.mxu1  ;;  %v1365_v35 = vadd.f32 %v1364_v32, %v290_v31  ;;  %v1406_v14 = vadd.f32 %v1405_v23, %v1363_v10 }
 0x13e   :  { %2149 = vmatpush2.bf16.msra.mxu1 %v3324_v16  ;;  %v1366_v34 = vpop.f32.mrf.mxu0 }
 0x13f   :  { %2150 = vmatprep.subr.bf16.mxu1 %v3329_v17  ;;  %v1409_v30 = vpop.f32.mrf.mxu1  ;;  %v1367_v38 = vadd.f32 %v1366_v34, %v294_v51  ;;  %v1408_v40 = vadd.f32 %v1407_v26, %v1365_v35 }
 0x141   :  { %v1489_v4 = vpop.f32.mrf.mxu1  ;;  %v1410_v45 = vadd.f32 %v1409_v30, %v1367_v38  ;;  %v3335_v38 = vld [vmem:[%s3691_s3 + $0x70] sm:$0xff]  }
 0x142   :  { %2151 = vmatpush2.bf16.msra.mxu1 %v3327_v18 }
 0x143   :  { %2152 = vmatprep.subr.bf16.mxu1 %v3332_v19  ;;  %v1491_v36 = vpop.f32.mrf.mxu1 }
 0x145   :  { %v1493_v42 = vpop.f32.mrf.mxu1 }
 0x146   :  { %2153 = vmatpush2.bf16.msra.mxu1 %v3330_v20 }
 0x147   :  { %v1495_v52 = vpop.f32.mrf.mxu1 }
 0x178   :  { %v1446_v37 = vpop.f32.mrf.mxu0 }
 0x179   :  { %v1447_v43 = vadd.f32 %v1446_v37, %v1404_v33  ;;  %v3333_v37 = vld [vmem:[%s3691_s3 + $0x78] sm:$0xff]  }
 0x17a   :  { %v1448_v39 = vpop.f32.mrf.mxu0  ;;  %2851 = vmatprep.subr.bf16.mxu0 %v3333_v37 }
 0x17b   :  { %v1449_v41 = vadd.f32 %v1448_v39, %v1406_v14  ;;  %v1490_v53 = vadd.f32 %v1489_v4, %v1447_v43  ;;  %v3334_v14 = vld [vmem:[%s3691_s3 + $0x38] sm:$0xff]  }
 0x17c   :  { %v1450_v44 = vpop.f32.mrf.mxu0 }
 0x17d   :  { %v1451_v46 = vadd.f32 %v1450_v44, %v1408_v40  ;;  %v1492_v48 = vadd.f32 %v1491_v36, %v1449_v41  ;;  %v1670_v58 = vmax.f32 %v1490_v53, 0.0  ;;  %v3337_v44 = vld [vmem:[%s3691_s3 + $0x68] sm:$0xff]   ;;  %v3344_v53 = vld [vmem:[%s3691_s3 + $0x10] sm:$0xff]  }
 0x17e   :  { %v1452_v47 = vpop.f32.mrf.mxu0 }
 0x17f   :  { %v1494_v49 = vadd.f32 %v1493_v42, %v1451_v46  ;;  %v1453_v50 = vadd.f32 %v1452_v47, %v1410_v45  ;;  %v1671_v56 = vmax.f32 %v1492_v48, 0.0  ;;  %v3336_v42 = vld [vmem:[%s3691_s3 + $0x30] sm:$0xff]   ;;  %v3338_v46 = vld [vmem:[%s3691_s3 + $0x28] sm:$0xff]   ;;  %v3339_v47 = vld [vmem:[%s3691_s3 + $0x60] sm:$0xff]  }
 0x180   :  { %v3340_v48 = vld [vmem:[%s3691_s3 + $0x20] sm:$0xff]  }
 0x181   :  { %v1496_v54 = vadd.f32 %v1495_v52, %v1453_v50  ;;  %v1674_v55 = vmax.f32 %v1494_v49, 0.0  ;;  %v1532_v61 = vpop.f32.mrf.mxu1  ;;  %v3341_v49 = vld [vmem:[%s3691_s3 + $0x58] sm:$0xff]   ;;  %v3343_v52 = vld [vmem:[%s3691_s3 + $0x50] sm:$0xff]  }
 0x182   :  { %v1533_v19 = vadd.f32 %v1532_v61, %v298_v12  ;;  %v3342_v50 = vld [vmem:[%s3691_s3 + $0x18] sm:$0xff]   ;;  %v3351_v61 = vld [vmem:[%s3692_s4 + $0x28] sm:$0xff]  }
 0x183   :  { %v1675_v57 = vmax.f32 %v1496_v54, 0.0  ;;  %v1678_v60 = vpack.c.bf16 %v1674_v55, %v1670_v58  ;;  %v1534_v62 = vpop.f32.mrf.mxu1  ;;  %v3345_v54 = vld [vmem:[%s3691_s3 + $0x48] sm:$0xff]   ;;  %v3349_v58 = vld [vmem:[%s3692_s4 + $0x38] sm:$0xff]  }
 0x184   :  { %v1535_v17 = vadd.f32 %v1534_v62, %v302_v9  ;;  %v3346_v55 = vld [vmem:[%s3691_s3 + $0x8] sm:$0xff]   ;;  %v3352_v62 = vld [vmem:[%s3692_s4 + $0x20] sm:$0xff]  }
 0x185   :  { %v1679_v59 = vpack.c.bf16 %v1675_v57, %v1671_v56  ;;  %v1536_v63 = vpop.f32.mrf.mxu1  ;;  %v3347_v56 = vld [vmem:[%s3691_s3 + $0x40] sm:$0xff]  }
 0x186   :  { %v1537_v18 = vadd.f32 %v1536_v63, %v298_v12  ;;  %v3348_v57 = vld [vmem:[%s3691_s3] sm:$0xff]  }
 0x187   :  { %2111 = vmatprep.mubr.bf16.mxu0 %v1679_v59  ;;  %v1538_v1 = vpop.f32.mrf.mxu1  ;;  %v3480_v59 = vmov 0.0  }
 0x188   :  { %2112 = vmatmul.mubr.bf16.vlgmr.msra.gmra.mxu0 %v1678_v60  ;;  %v1539_v22 = vadd.f32 %v1538_v1, %v302_v9  ;;  %2887 = vmatprep.subr.bf16.mxu1 %v3480_v59  ;;  %v3350_v60 = vld [vmem:[%s3692_s4 + $0x30] sm:$0xff]   ;;  %v1747_v1 = vld [vmem:[#allocation8 + $0x1] ss:$8 sm:$0x3] }
 0x189   :  { %2852 = vmatpush3.bf16.msra.mxu0 %v3334_v14  ;;  %v1756_v3 = vrot.slane %v1747_v1, %v293_v27 }
 0x18a   :  { %2853 = vmatprep.subr.bf16.mxu0 %v3335_v38 }
 0x18d   :  { %2854 = vmatpush3.bf16.msra.mxu0 %v3336_v42  ;;  %v3360_v42 = vld [vmem:[%s3693_s5] sm:$0xff]  }
 0x18e   :  { %2855 = vmatprep.subr.bf16.mxu0 %v3337_v44 }
 0x191   :  { %2856 = vmatpush3.bf16.msra.mxu0 %v3338_v46 }
 0x192   :  { %2857 = vmatprep.subr.bf16.mxu0 %v3339_v47 }
 0x195   :  { %2858 = vmatpush3.bf16.msra.mxu0 %v3340_v48 }
 0x196   :  { %2859 = vmatprep.subr.bf16.mxu0 %v3341_v49 }
 0x199   :  { %2860 = vmatpush3.bf16.msra.mxu0 %v3342_v50 }
 0x19a   :  { %2861 = vmatprep.subr.bf16.mxu0 %v3343_v52 }
 0x19d   :  { %2862 = vmatpush3.bf16.msra.mxu0 %v3344_v53 }
 0x19e   :  { %2863 = vmatprep.subr.bf16.mxu0 %v3345_v54  ;;  %v2461_v54 = vld [vmem:[#allocation8 + $0x4] ss:$0 sm:$0xff] }
 0x1a1   :  { %2864 = vmatpush3.bf16.msra.mxu0 %v3346_v55 }
 0x1a2   :  { %2865 = vmatprep.subr.bf16.mxu0 %v3347_v56 }
 0x1a5   :  { %2866 = vmatpush3.bf16.msra.mxu0 %v3348_v57 }
 0x1a6   :  { %2907 = vmatprep.subr.bf16.mxu0 %v3480_v59 }
 0x1b8   :  { %v1575_v0 = vpop.f32.mrf.mxu0 }
 0x1b9   :  { %v1576_v26 = vadd.f32 %v1575_v0, %v1533_v19 }
 0x1ba   :  { %v1577_v6 = vpop.f32.mrf.mxu0 }
 0x1bb   :  { %v1578_v23 = vadd.f32 %v1577_v6, %v1535_v17  ;;  %v1752_v6 = vrot.slane %v1747_v1, %v289_v5  ;;  %v3353_v5 = vld [vmem:[%s3692_s4 + $0x18] sm:$0xff]  }
 0x1bc   :  { %v1579_v13 = vpop.f32.mrf.mxu0 }
 0x1bd   :  { %v1580_v25 = vadd.f32 %v1579_v13, %v1537_v18 }
 0x1be   :  { %v1581_v20 = vpop.f32.mrf.mxu0 }
 0x1bf   :  { %v1582_v30 = vadd.f32 %v1581_v20, %v1539_v22 }
 0x1c1   :  { %v1618_v7 = vpop.f32.mrf.mxu1 }
 0x1c2   :  { %v1619_v32 = vadd.f32 %v1618_v7, %v1576_v26 }
 0x1c3   :  { %v1620_v8 = vpop.f32.mrf.mxu1 }
 0x1c4   :  { %v1621_v51 = vadd.f32 %v1620_v8, %v1578_v23 }
 0x1c5   :  { %v1622_v15 = vpop.f32.mrf.mxu1 }
 0x1c6   :  { %v1623_v31 = vadd.f32 %v1622_v15, %v1580_v25 }
 0x1c7   :  { %v1624_v16 = vpop.f32.mrf.mxu1 }
 0x1c8   :  { %v1625_v10 = vadd.f32 %v1624_v16, %v1582_v30  ;;  %v3354_v30 = vld [vmem:[%s3692_s4 + $0x10] sm:$0xff]  }
 0x1c9   :  { %v1661_v21 = vpop.f32.mrf.mxu1 }
 0x1ca   :  { %v1662_v34 = vadd.f32 %v1661_v21, %v1619_v32  ;;  %v3357_v32 = vld [vmem:[%s3693_s5 + $0x18] sm:$0xff]  }
 0x1cb   :  { %v1663_v28 = vpop.f32.mrf.mxu1 }
 0x1cc   :  { %v1664_v29 = vadd.f32 %v1663_v28, %v1621_v51  ;;  %v1672_v41 = vmax.f32 %v1662_v34, 0.0  ;;  %v3355_v51 = vld [vmem:[%s3692_s4 + $0x8] sm:$0xff]  }
 0x1cd   :  { %v1665_v4 = vpop.f32.mrf.mxu1 }
 0x1ce   :  { %v1666_v11 = vadd.f32 %v1665_v4, %v1623_v31  ;;  %v1673_v39 = vmax.f32 %v1664_v29, 0.0  ;;  %v3356_v31 = vld [vmem:[%s3692_s4] sm:$0xff]  }
 0x1cf   :  { %v1667_v35 = vpop.f32.mrf.mxu1 }
 0x1d0   :  { %v1668_v36 = vadd.f32 %v1667_v35, %v1625_v10  ;;  %v1676_v33 = vmax.f32 %v1666_v11, 0.0  ;;  %v2203_v11 = vld [vmem:[#allocation8 + $0x2] ss:$0 sm:$0xff] }
 0x1d2   :  { %v1677_v40 = vmax.f32 %v1668_v36, 0.0  ;;  %v1680_v45 = vpack.c.bf16 %v1676_v33, %v1672_v41  ;;  %v3359_v41 = vld [vmem:[%s3693_s5 + $0x8] sm:$0xff]  }
 0x1d4   :  { %v1681_v43 = vpack.c.bf16 %v1677_v40, %v1673_v39  ;;  %v3358_v40 = vld [vmem:[%s3693_s5 + $0x10] sm:$0xff]   ;;  %s2539_s5 = sshll.u32 %s3482_s27, 4  ;;  %s2540_s5 = int_to_ptr.vmem [resolvable:$true] %s2539_s5 }
 0x1d5   :  { %s3441_s28 = scalar_lea.vmem %s2540_s5, 256  ;;  %p3446_p7 = scmp.lt.s32.totalorder %s2540_s5, %s2540_s5 }
 0x1d6   :  { %2154 = vmatprep.mubr.bf16.mxu1 %v1681_v43  ;;  %v2360_v43 = vld [vmem:[#allocation8 + $0x3] ss:$0 sm:$0xff]  ;;  %p3442_p6 = scmp.ne.s32.totalorder %s2540_s5, %s3441_s28  ;;  %p3447_p8 = scmp.lt.s32.totalorder %s3441_s28, %s3441_s28 }
 0x1d7   :  { %2155 = vmatmul.mubr.bf16.vlgmr.msra.gmra.mxu1 %v1680_v45 }
 0x1d8   :  { %2888 = vmatpush3.bf16.msra.mxu1 %v3349_v58  ;;  %2903 = vmatprep.mubr.msk.bf16.mxu1 %vm3481_vm1, %v3480_v59  ;;  %p3448_p9 = por %p3447_p8, %p3446_p7 }
 0x1d9   :  { %2889 = vmatprep.subr.bf16.mxu1 %v3480_v59 }
 0x1da   :  { %p3449_p10 = pnand %p3448_p9, %p3442_p6 }
 0x1dc   :  { %2890 = vmatpush3.bf16.msra.mxu1 %v3350_v60 }
 0x1dd   :  { %2891 = vmatprep.subr.bf16.mxu1 %v3480_v59 }
 0x1e0   :  { %2892 = vmatpush3.bf16.msra.mxu1 %v3351_v61 }
 0x1e1   :  { %2893 = vmatprep.subr.bf16.mxu1 %v3480_v59 }
 0x1e4   :  { %2894 = vmatpush3.bf16.msra.mxu1 %v3352_v62 }
 0x1e5   :  { %2895 = vmatprep.subr.bf16.mxu1 %v3480_v59 }
 0x1e8   :  { %2896 = vmatpush3.bf16.msra.mxu1 %v3353_v5 }
 0x1e9   :  { %2897 = vmatprep.subr.bf16.mxu1 %v3480_v59 }
 0x1ec   :  { %2898 = vmatpush3.bf16.msra.mxu1 %v3354_v30 }
 0x1ed   :  { %2899 = vmatprep.subr.bf16.mxu1 %v3480_v59 }
 0x1f0   :  { %2900 = vmatpush3.bf16.msra.mxu1 %v3355_v51 }
 0x1f1   :  { %2901 = vmatprep.subr.bf16.mxu1 %v3480_v59 }
 0x1f4   :  { %2902 = vmatpush3.bf16.msra.mxu1 %v3356_v31 }
 0x248   :  { %v2113_v63 = vpop.f32.mrf.mxu0 }
 0x249   :  { %v2114_v15 = vadd.f32 %v2113_v63, %v1752_v6 }
 0x24a   :  { %v2115_v0 = vpop.f32.mrf.mxu0 }
 0x24b   :  { %v2116_v12 = vadd.f32 %v2115_v0, %v1756_v3 }
 0x24c   :  { %v2117_v2 = vpop.f32.mrf.mxu0 }
 0x24d   :  { %v2118_v13 = vadd.f32 %v2117_v2, %v1752_v6 }
 0x24e   :  { %v2119_v8 = vpop.f32.mrf.mxu0 }
 0x24f   :  { %v2120_v17 = vadd.f32 %v2119_v8, %v1756_v3 }
 0x297   :  { %v2156_v7 = vpop.f32.mrf.mxu1 }
 0x298   :  { %v2157_v20 = vadd.f32 %v2156_v7, %v2114_v15 }
 0x299   :  { %v2158_v9 = vpop.f32.mrf.mxu1 }
 0x29a   :  { %v2159_v18 = vadd.f32 %v2158_v9, %v2116_v12  ;;  %v2165_v27 = vmax.f32 %v2157_v20, 0.0 }
 0x29b   :  { %v2160_v16 = vpop.f32.mrf.mxu1 }
 0x29c   :  { %v2161_v19 = vadd.f32 %v2160_v16, %v2118_v13  ;;  %v2166_v25 = vmax.f32 %v2159_v18, 0.0 }
 0x29d   :  { %v2162_v21 = vpop.f32.mrf.mxu1 }
 0x29e   :  { %v2163_v22 = vadd.f32 %v2162_v21, %v2120_v17  ;;  %v2167_v23 = vmax.f32 %v2161_v19, 0.0 }
 0x2a0   :  { %v2168_v26 = vmax.f32 %v2163_v22, 0.0  ;;  %v2169_v24 = vpack.c.bf16 %v2167_v23, %v2165_v27 }
 0x2a2   :  { %v2170_v28 = vpack.c.bf16 %v2168_v26, %v2166_v25 }
 0x2a4   :  { %2332 = vmatprep.mubr.bf16.mxu0 %v2170_v28 }
 0x2a5   :  { %2333 = vmatmul.mubr.bf16.vlgmr.msra.gmra.mxu0 %v2169_v24 }
 0x2a6   :  { %2915 = vmatprep.mubr.msk.bf16.mxu0 %vm3481_vm1, %v3480_v59  ;;  %2908 = vmatpush3.bf16.msra.mxu0 %v3357_v32 }
 0x2a7   :  { %2909 = vmatprep.subr.bf16.mxu0 %v3480_v59 }
 0x2aa   :  { %2910 = vmatpush3.bf16.msra.mxu0 %v3358_v40 }
 0x2ab   :  { %2911 = vmatprep.subr.bf16.mxu0 %v3480_v59 }
 0x2ae   :  { %2912 = vmatpush3.bf16.msra.mxu0 %v3359_v41 }
 0x2af   :  { %2913 = vmatprep.subr.bf16.mxu0 %v3480_v59 }
 0x2b2   :  { %2914 = vmatpush3.bf16.msra.mxu0 %v3360_v42 }
 0x365   :  { %v2867_v4 = vpop.f32.mrf.mxu0 }
 0x367   :  { %v2868_v10 = vpop.f32.mrf.mxu0 }
 0x368   :  { %v2869_v29 = vadd.f32 %v2868_v10, %v2867_v4 }
 0x369   :  { %v2870_v34 = vpop.f32.mrf.mxu0 }
 0x36a   :  { %v2335_v36 = vadd.f32 %v2869_v29, %v2203_v11 }
 0x36b   :  { %v2871_v35 = vpop.f32.mrf.mxu0 }
 0x36c   :  { %v2872_v37 = vadd.f32 %v2871_v35, %v2870_v34  ;;  %v2341_v38 = vmax.f32 %v2335_v36, 0.0 }
 0x36e   :  { %v2338_v14 = vadd.f32 %v2872_v37, %v2203_v11 }
 0x370   :  { %v2342_v33 = vmax.f32 %v2338_v14, 0.0 }
 0x372   :  { %v2343_v39 = vpack.c.bf16 %v2342_v33, %v2341_v38 }
 0x374   :  { %2904 = vmatmul.mubr.bf16.vlgmr.msra.gmra.mxu1 %v2343_v39 }
 0x434   :  { %v2443_v44 = vpop.f32.mrf.mxu1 }
 0x435   :  { %v2444_v46 = vadd.f32 %v2443_v44, %v2360_v43 }
 0x436   :  { %v2905_v45 = vpop.f32.mrf.mxu1 }
 0x437   :  { %v2450_v50 = vmax.f32 %v2444_v46, 0.0 }
 0x438   :  { %v2446_v47 = vpop.f32.mrf.mxu1 }
 0x439   :  { %v2447_v48 = vadd.f32 %v2446_v47, %v2360_v43 }
 0x43a   :  { %v2906_v49 = vpop.f32.mrf.mxu1 }
 0x43b   :  { %v2451_v52 = vmax.f32 %v2447_v48, 0.0 }
 0x43d   :  { %v2452_v53 = vpack.c.bf16 %v2451_v52, %v2450_v50 }
 0x43f   :  { %2916 = vmatmul.mubr.msk.bf16.vlgmr.msra.gmra.mxu0 %vm2486_vm2, %v2452_v53 }
 0x4ff   :  { %v2524_v55 = vpop.f32.mrf.mxu0 }
 0x500   :  { %v2525_v56 = vadd.f32 %v2524_v55, %v2461_v54 }
 0x501   :  { %v2917_v57 = vpop.f32.mrf.mxu0 }
 0x502   :  { %2532 = vst.msk [vmem:[#allocation10] sm:$0xff] %vm2531_vm3, %v2525_v56 }
 0x503   :  { %v2527_v58 = vpop.f32.mrf.mxu0 }
 0x504   :  { %v2528_v59 = vadd.f32 %v2527_v58, %v2461_v54 }
 0x505   :  { %v2918_v60 = vpop.f32.mrf.mxu0 }
 0x506   :  { %2533 = vst.msk [vmem:[#allocation10 + $0x8] sm:$0xff] %vm2531_vm3, %v2528_v59 }
 0x507   :  { %3452 = shalt.err (!%p3449_p10)
}
 0x508   :  { %2545 = dma.vmem_to_hbm [thread:$0]  %s2540_s5, 256, %s3695_s7, [#allocation4], %s3476_s17, %s3476_s17, %s3477_s18  }
 0x509   :  { %3467 = dma.done.wait [#allocation4], 256  }
 0x50a   :  { %3468 = vsyncadd [#allocation4], 4294967040 }
 0x50b   :  { %2549 = vsyncpa [#allocation3], 1 }
 0x50c   :  { %2550 = vsyncpa [#allocation6], 1 }
 0x50d   :  { %2551 = vsyncpa [#allocation9], 1 }
 0x50e   :  { %2552 = vsyncpa [#allocation4], 1 }

</bundles_post_ra>
